<compile_context>
chip_gen: v7x
topology: tpu7x:2x2x1
jax: 0.10.0
libtpu: 0.0.40
codegen_flags: <defaults>
</compile_context>

<pallas_src>
import jax
import jax.numpy as jnp
from jax.experimental import pallas as pl
from jax.experimental.pallas import tpu as pltpu

LN_EPS = 1e-5


def _round_up(n, m):
    return ((n + m - 1) // m) * m


def _default_vmem_limit():
    """~80% of the chip's physical VMEM (never the full amount), <= 100 MiB."""
    try:
        info = pltpu.get_tpu_info()
        cap = getattr(info, "vmem_capacity_bytes", None) or 64 * 1024 * 1024
    except Exception:  # no TPU info available -> conservative (v7x per-TC) value
        cap = 64 * 1024 * 1024
    return min(int(cap * 0.8), 100 * 1024 * 1024)


def _make_kernel(hidden_real, compute_dtype, one_pass_ln=True):
    """Fused Linear -> LayerNorm -> ReLU -> Linear kernel body.

    hidden_real is the un-padded LayerNorm width.  Invariant (enforced by
    prepare_params): padded hidden columns of h are exactly 0 (zero-padded w1
    columns and b1), and gamma/beta are 0 in padded lanes, so padded lanes stay
    0 through LN/ReLU and the zero-padded w2 rows keep the second dot exact.
    """
    inv_h = 1.0 / float(hidden_real)

    def kernel(x_ref, w1_ref, b1_ref, gamma_ref, beta_ref, w2_ref, b2_ref, o_ref):
        # ---- Linear 1: bf16 x bf16 -> f32 accumulate on the MXU -------------
        h = jnp.dot(x_ref[...], w1_ref[...], preferred_element_type=jnp.float32)
        h = h + b1_ref[...]                                   # bias in f32

        # ---- LayerNorm over the real hidden width (f32 VPU/EUP math) --------
        if one_pass_ln:
            # One pass over h: sums over padded width equal sums over the real
            # width because padded columns are exactly 0.
            s1 = jnp.sum(h, axis=-1, keepdims=True)
            s2 = jnp.sum(h * h, axis=-1, keepdims=True)
            mean = s1 * inv_h
            var = jnp.maximum(s2 * inv_h - mean * mean, 0.0)  # numeric guard
            cent = h - mean
        else:
            # Centered two-pass fallback (slightly more stable numerics).
            hid_p = h.shape[-1]
            mean = jnp.sum(h, axis=-1, keepdims=True) * inv_h
            cent = h - mean
            if hid_p != hidden_real:
                col = jax.lax.broadcasted_iota(jnp.int32, h.shape, dimension=1)
                cent = jnp.where(col < hidden_real, cent, 0.0)
            var = jnp.sum(cent * cent, axis=-1, keepdims=True) * inv_h
        hn = cent * jax.lax.rsqrt(var + LN_EPS) * gamma_ref[...] + beta_ref[...]

        # ---- ReLU ------------------------------------------------------------
        a = jnp.maximum(hn, 0.0)

        # ---- Linear 2: downcast activations only at the MXU input ------------
        out = jnp.dot(a.astype(compute_dtype), w2_ref[...],
                      preferred_element_type=jnp.float32)
        o_ref[...] = (out + b2_ref[...]).astype(o_ref.dtype)

    return kernel


def prepare_params(params, compute_dtype=jnp.bfloat16, lane_align=128):
    """Pad feature dims to lane multiples and cast matmul weights to bf16.

    Do this ONCE and reuse across forward calls.  lane_align=256 can improve
    MXU utilization on v6e/v7x for large real dims; 128 is optimal for small
    dims and matches v5e's 128x128 MXU.
    """
    assert lane_align % 128 == 0
    in_dim, hidden = params["w1"].shape
    out_dim = params["w2"].shape[1]
    in_p = _round_up(in_dim, lane_align)
    hid_p = _round_up(hidden, lane_align)
    out_p = _round_up(out_dim, lane_align)

    # Zero padding everywhere is the correctness invariant the kernel's
    # unmasked LayerNorm sums rely on -- do not change to non-zero fill.
    prep = {
        "w1": jnp.zeros((in_p, hid_p), compute_dtype)
                 .at[:in_dim, :hidden].set(params["w1"].astype(compute_dtype)),
        "b1": jnp.zeros((1, hid_p), jnp.float32).at[:, :hidden].set(params["b1"]),
        "gamma": jnp.zeros((1, hid_p), jnp.float32).at[:, :hidden].set(params["gamma"]),
        "beta": jnp.zeros((1, hid_p), jnp.float32).at[:, :hidden].set(params["beta"]),
        "w2": jnp.zeros((hid_p, out_p), compute_dtype)
                 .at[:hidden, :out_dim].set(params["w2"].astype(compute_dtype)),
        "b2": jnp.zeros((1, out_p), jnp.float32).at[:, :out_dim].set(params["b2"]),
    }
    dims = dict(in_dim=in_dim, hidden=hidden, out_dim=out_dim,
                in_p=in_p, hid_p=hid_p, out_p=out_p,
                compute_dtype=compute_dtype)
    return prep, dims


def mlp_forward(x, prep, dims, *, tile_m=256, vmem_limit_bytes=None,
                single_buffer_weights=True, one_pass_ln=True):
    """x: (N, in_dim) float32.  prep/dims: output of prepare_params()."""
    N, in_dim = x.shape
    assert in_dim == dims["in_dim"]
    in_p, hid_p, out_p = dims["in_p"], dims["hid_p"], dims["out_p"]
    out_dim = dims["out_dim"]
    cdt = dims["compute_dtype"]

    if vmem_limit_bytes is None:
        vmem_limit_bytes = _default_vmem_limit()

    # tile_m: multiple of 16 (min bf16 sublane tile); capped so the batch grid
    # has >= 2 steps whenever N allows, letting the "parallel" axis shard
    # across v7x's two TensorCores.
    half = _round_up(-(-N // 2), 16)
    tile_m = max(16, _round_up(min(tile_m, half), 16))
    n_p = _round_up(N, tile_m)
    grid = (n_p // tile_m,)

    # Only pad x when it is actually ragged; cast to the MXU compute dtype.
    xp = x.astype(cdt)
    if n_p != N or in_p != in_dim:
        xp = jnp.pad(xp, ((0, n_p - N), (0, in_p - in_dim)))

    kernel = _make_kernel(dims["hidden"], cdt, one_pass_ln=one_pass_ln)

    param_bytes = sum(int(v.size) * v.dtype.itemsize for v in prep.values())
    cost = pl.CostEstimate(
        flops=2 * n_p * (in_p * hid_p + hid_p * out_p),
        transcendentals=n_p,                       # one rsqrt per row
        bytes_accessed=int(xp.size) * xp.dtype.itemsize
                       + param_bytes + n_p * out_p * 4,
    )

    def build(single_buf):
        def inv_spec(shape):
            # Grid-invariant operand: fetched once; single-buffer it so its
            # VMEM footprint is not doubled by the pipeline.
            if single_buf:
                return pl.BlockSpec(shape, lambda i: (0, 0),
                                    pipeline_mode=pl.Buffered(1))
            return pl.BlockSpec(shape, lambda i: (0, 0))

        return pl.pallas_call(
            kernel,
            out_shape=jax.ShapeDtypeStruct((n_p, out_p), jnp.float32),
            grid_spec=pltpu.PrefetchScalarGridSpec(
                num_scalar_prefetch=0,
                grid=grid,
                in_specs=[
                    pl.BlockSpec((tile_m, in_p), lambda i: (i, 0)),  # x tile
                    inv_spec((in_p, hid_p)),                         # w1
                    inv_spec((1, hid_p)),                            # b1
                    inv_spec((1, hid_p)),                            # gamma
                    inv_spec((1, hid_p)),                            # beta
                    inv_spec((hid_p, out_p)),                        # w2
                    inv_spec((1, out_p)),                            # b2
                ],
                out_specs=pl.BlockSpec((tile_m, out_p), lambda i: (i, 0)),
            ),
            compiler_params=pltpu.CompilerParams(
                dimension_semantics=("parallel",),   # batch axis -> megacore
                vmem_limit_bytes=vmem_limit_bytes,
            ),
            cost_estimate=cost,
        )

    args = (xp, prep["w1"], prep["b1"], prep["gamma"], prep["beta"],
            prep["w2"], prep["b2"])
    if single_buffer_weights:
        try:
            out = build(True)(*args)
        except Exception:
            # Older jax without pipeline_mode / Buffered(1): default buffering.
            out = build(False)(*args)
    else:
        out = build(False)(*args)

    if n_p != N or out_p != out_dim:
        out = out[:N, :out_dim]
    return out


def init_params(key, in_dim, hidden_dim, out_dim):
    """Deterministic init matching nn.Linear (uniform +/- 1/sqrt(fan_in)) and
    nn.LayerNorm (gamma=1, beta=0).  Weights stored (in, out), f32 masters."""
    k1, k2, k3, k4 = jax.random.split(key, 4)
    bound1 = 1.0 / jnp.sqrt(in_dim)
    bound2 = 1.0 / jnp.sqrt(hidden_dim)
    return {
        "w1": jax.random.uniform(k1, (in_dim, hidden_dim), jnp.float32,
                                 -bound1, bound1),
        "b1": jax.random.uniform(k2, (1, hidden_dim), jnp.float32,
                                 -bound1, bound1),
        "gamma": jnp.ones((1, hidden_dim), jnp.float32),
        "beta": jnp.zeros((1, hidden_dim), jnp.float32),
        "w2": jax.random.uniform(k3, (hidden_dim, out_dim), jnp.float32,
                                 -bound2, bound2),
        "b2": jax.random.uniform(k4, (1, out_dim), jnp.float32,
                                 -bound2, bound2),
    }


def mlp_reference(x, p, compute_dtype=jnp.bfloat16):
    """Pure-JAX reference with the same bf16-in / f32-accumulate matmul
    semantics as the kernel (LayerNorm / ReLU / biases in f32)."""
    h = jnp.dot(x.astype(compute_dtype), p["w1"].astype(compute_dtype),
                preferred_element_type=jnp.float32) + p["b1"]
    mean = jnp.mean(h, axis=-1, keepdims=True)
    var = jnp.mean((h - mean) ** 2, axis=-1, keepdims=True)
    hn = (h - mean) * jax.lax.rsqrt(var + LN_EPS) * p["gamma"] + p["beta"]
    a = jnp.maximum(hn, 0.0)
    return jnp.dot(a.astype(compute_dtype), p["w2"].astype(compute_dtype),
                   preferred_element_type=jnp.float32) + p["b2"]


if __name__ == "__main__":
    # Shapes consistent with MLP(in_dim=16, out_dim=16, hidden_dim=32,
    # num_layer=2, norm=True, act_fn='relu', act_last=False).
    # N and the feature dims are deliberately NOT tile multiples to exercise
    # the padding path; tile_m is capped so the batch grid still has 2 steps.
    N, in_dim, hidden_dim, out_dim = 200, 16, 32, 16

    key = jax.random.PRNGKey(0)
    kx, kp = jax.random.split(key)
    x = jax.random.normal(kx, (N, in_dim), jnp.float32)
    params = init_params(kp, in_dim, hidden_dim, out_dim)

    # Weight padding / bf16 casting is done once, outside the per-call path.
    prep, dims = prepare_params(params)

    out = mlp_forward(x, prep, dims, tile_m=128)
    out = jax.block_until_ready(out)

    ref = mlp_reference(x, params)
    assert out.shape == (N, out_dim)
    assert jnp.allclose(out, ref, atol=1e-3, rtol=1e-3), "mismatch vs reference"

    print("KERNEL_OK")
</pallas_src>

<mosaic_0001>
module attributes {stable_mosaic.version = 11 : i64} {
  func.func @kernel(%arg0: i32, %arg1: memref<112x128xbf16, #tpu.memory_space<vmem>>, %arg2: memref<128x128xbf16, #tpu.memory_space<vmem>>, %arg3: memref<1x128xf32, #tpu.memory_space<vmem>>, %arg4: memref<1x128xf32, #tpu.memory_space<vmem>>, %arg5: memref<1x128xf32, #tpu.memory_space<vmem>>, %arg6: memref<128x128xbf16, #tpu.memory_space<vmem>>, %arg7: memref<1x128xf32, #tpu.memory_space<vmem>>, %arg8: memref<112x128xf32, #tpu.memory_space<vmem>>) attributes {dimension_semantics = [#tpu.dimension_semantics<parallel>], iteration_bounds = array<i64: 2>, scalar_prefetch = 0 : i64, scratch_operands = 0 : i64, tpu.core_type = #tpu.core_type<tc>, window_params = [{transform_indices = @transform_0, window_bounds = array<i64: 112, 128>}, {pipeline_mode = #tpu.pipeline_mode<synchronous>, transform_indices = @transform_1, window_bounds = array<i64: 128, 128>}, {pipeline_mode = #tpu.pipeline_mode<synchronous>, transform_indices = @transform_2, window_bounds = array<i64: 1, 128>}, {pipeline_mode = #tpu.pipeline_mode<synchronous>, transform_indices = @transform_3, window_bounds = array<i64: 1, 128>}, {pipeline_mode = #tpu.pipeline_mode<synchronous>, transform_indices = @transform_4, window_bounds = array<i64: 1, 128>}, {pipeline_mode = #tpu.pipeline_mode<synchronous>, transform_indices = @transform_5, window_bounds = array<i64: 128, 128>}, {pipeline_mode = #tpu.pipeline_mode<synchronous>, transform_indices = @transform_6, window_bounds = array<i64: 1, 128>}, {transform_indices = @transform_7, window_bounds = array<i64: 112, 128>}]} {
    %c0 = arith.constant 0 : index
    %c0_0 = arith.constant 0 : index
    %0 = vector.load %arg1[%c0, %c0_0] : memref<112x128xbf16, #tpu.memory_space<vmem>>, vector<112x128xbf16>
    %c0_1 = arith.constant 0 : index
    %c0_2 = arith.constant 0 : index
    %1 = vector.load %arg2[%c0_1, %c0_2] : memref<128x128xbf16, #tpu.memory_space<vmem>>, vector<128x128xbf16>
    %cst = arith.constant dense<0.000000e+00> : vector<112x128xf32>
    %2 = tpu.matmul %0, %1, %cst {dimension_numbers = #tpu.dot_dimension_numbers<[1], [0], [0], [1], [0, 0, 1, 1], [], []>} : vector<112x128xbf16>, vector<128x128xbf16>, vector<112x128xf32> -> vector<112x128xf32>
    %c0_3 = arith.constant 0 : index
    %c0_4 = arith.constant 0 : index
    %3 = vector.load %arg3[%c0_3, %c0_4] : memref<1x128xf32, #tpu.memory_space<vmem>>, vector<1x128xf32>
    %4 = vector.broadcast %3 : vector<1x128xf32> to vector<112x128xf32>
    %5 = arith.addf %2, %4 : vector<112x128xf32>
    %cst_5 = arith.constant dense<0.000000e+00> : vector<112xf32>
    %6 = vector.multi_reduction <add>, %5, %cst_5 [1] : vector<112x128xf32> to vector<112xf32>
    %7 = vector.shape_cast %6 : vector<112xf32> to vector<112x1xf32>
    %8 = arith.mulf %5, %5 : vector<112x128xf32>
    %cst_6 = arith.constant dense<0.000000e+00> : vector<112xf32>
    %9 = vector.multi_reduction <add>, %8, %cst_6 [1] : vector<112x128xf32> to vector<112xf32>
    %10 = vector.shape_cast %9 : vector<112xf32> to vector<112x1xf32>
    %cst_7 = arith.constant 3.125000e-02 : f32
    %11 = vector.broadcast %cst_7 : f32 to vector<112x1xf32>
    %12 = arith.mulf %7, %11 : vector<112x1xf32>
    %cst_8 = arith.constant 3.125000e-02 : f32
    %13 = vector.broadcast %cst_8 : f32 to vector<112x1xf32>
    %14 = arith.mulf %10, %13 : vector<112x1xf32>
    %15 = arith.mulf %12, %12 : vector<112x1xf32>
    %16 = arith.subf %14, %15 : vector<112x1xf32>
    %cst_9 = arith.constant 0.000000e+00 : f32
    %17 = vector.broadcast %cst_9 : f32 to vector<112x1xf32>
    %18 = arith.maximumf %16, %17 : vector<112x1xf32>
    %19 = vector.broadcast %12 : vector<112x1xf32> to vector<112x128xf32>
    %20 = arith.subf %5, %19 : vector<112x128xf32>
    %cst_10 = arith.constant 9.99999974E-6 : f32
    %21 = vector.broadcast %cst_10 : f32 to vector<112x1xf32>
    %22 = arith.addf %18, %21 : vector<112x1xf32>
    %23 = math.rsqrt %22 : vector<112x1xf32>
    %24 = vector.broadcast %23 : vector<112x1xf32> to vector<112x128xf32>
    %25 = arith.mulf %20, %24 : vector<112x128xf32>
    %c0_11 = arith.constant 0 : index
    %c0_12 = arith.constant 0 : index
    %26 = vector.load %arg4[%c0_11, %c0_12] : memref<1x128xf32, #tpu.memory_space<vmem>>, vector<1x128xf32>
    %27 = vector.broadcast %26 : vector<1x128xf32> to vector<112x128xf32>
    %28 = arith.mulf %25, %27 : vector<112x128xf32>
    %c0_13 = arith.constant 0 : index
    %c0_14 = arith.constant 0 : index
    %29 = vector.load %arg5[%c0_13, %c0_14] : memref<1x128xf32, #tpu.memory_space<vmem>>, vector<1x128xf32>
    %30 = vector.broadcast %29 : vector<1x128xf32> to vector<112x128xf32>
    %31 = arith.addf %28, %30 : vector<112x128xf32>
    %cst_15 = arith.constant 0.000000e+00 : f32
    %32 = vector.broadcast %cst_15 : f32 to vector<112x128xf32>
    %33 = arith.maximumf %31, %32 : vector<112x128xf32>
    %34 = arith.truncf %33 : vector<112x128xf32> to vector<112x128xbf16>
    %c0_16 = arith.constant 0 : index
    %c0_17 = arith.constant 0 : index
    %35 = vector.load %arg6[%c0_16, %c0_17] : memref<128x128xbf16, #tpu.memory_space<vmem>>, vector<128x128xbf16>
    %cst_18 = arith.constant dense<0.000000e+00> : vector<112x128xf32>
    %36 = tpu.matmul %34, %35, %cst_18 {dimension_numbers = #tpu.dot_dimension_numbers<[1], [0], [0], [1], [0, 0, 1, 1], [], []>} : vector<112x128xbf16>, vector<128x128xbf16>, vector<112x128xf32> -> vector<112x128xf32>
    %c0_19 = arith.constant 0 : index
    %c0_20 = arith.constant 0 : index
    %37 = vector.load %arg7[%c0_19, %c0_20] : memref<1x128xf32, #tpu.memory_space<vmem>>, vector<1x128xf32>
    %38 = vector.broadcast %37 : vector<1x128xf32> to vector<112x128xf32>
    %39 = arith.addf %36, %38 : vector<112x128xf32>
    %c0_21 = arith.constant 0 : index
    %c0_22 = arith.constant 0 : index
    %40 = vector.load %arg8[%c0_21, %c0_22] : memref<112x128xf32, #tpu.memory_space<vmem>>, vector<112x128xf32>
    tpu.vector_store %arg8[%c0_21, %c0_22], %39 {strides = array<i32>} : memref<112x128xf32, #tpu.memory_space<vmem>>, vector<112x128xf32>,
    return
  }
  func.func @transform_0(%arg0: i32) -> (i32, i32) {
    %c0_i32 = arith.constant 0 : i32
    %c0_i32_0 = arith.constant 0 : i32
    return %arg0, %c0_i32 : i32, i32
  }
  func.func @transform_1(%arg0: i32) -> (i32, i32) {
    %c0_i32 = arith.constant 0 : i32
    %c0_i32_0 = arith.constant 0 : i32
    %c0_i32_1 = arith.constant 0 : i32
    return %c0_i32, %c0_i32_0 : i32, i32
  }
  func.func @transform_2(%arg0: i32) -> (i32, i32) {
    %c0_i32 = arith.constant 0 : i32
    %c0_i32_0 = arith.constant 0 : i32
    %c0_i32_1 = arith.constant 0 : i32
    return %c0_i32, %c0_i32_0 : i32, i32
  }
  func.func @transform_3(%arg0: i32) -> (i32, i32) {
    %c0_i32 = arith.constant 0 : i32
    %c0_i32_0 = arith.constant 0 : i32
    %c0_i32_1 = arith.constant 0 : i32
    return %c0_i32, %c0_i32_0 : i32, i32
  }
  func.func @transform_4(%arg0: i32) -> (i32, i32) {
    %c0_i32 = arith.constant 0 : i32
    %c0_i32_0 = arith.constant 0 : i32
    %c0_i32_1 = arith.constant 0 : i32
    return %c0_i32, %c0_i32_0 : i32, i32
  }
  func.func @transform_5(%arg0: i32) -> (i32, i32) {
    %c0_i32 = arith.constant 0 : i32
    %c0_i32_0 = arith.constant 0 : i32
    %c0_i32_1 = arith.constant 0 : i32
    return %c0_i32, %c0_i32_0 : i32, i32
  }
  func.func @transform_6(%arg0: i32) -> (i32, i32) {
    %c0_i32 = arith.constant 0 : i32
    %c0_i32_0 = arith.constant 0 : i32
    %c0_i32_1 = arith.constant 0 : i32
    return %c0_i32, %c0_i32_0 : i32, i32
  }
  func.func @transform_7(%arg0: i32) -> (i32, i32) {
    %c0_i32 = arith.constant 0 : i32
    %c0_i32_0 = arith.constant 0 : i32
    return %arg0, %c0_i32 : i32, i32
  }
}

module attributes {stable_mosaic.version = 11 : i64} {
  func.func @kernel(%arg0: i32, %arg1: memref<112x128xbf16, #tpu.memory_space<vmem>>, %arg2: memref<128x128xbf16, #tpu.memory_space<vmem>>, %arg3: memref<1x128xf32, #tpu.memory_space<vmem>>, %arg4: memref<1x128xf32, #tpu.memory_space<vmem>>, %arg5: memref<1x128xf32, #tpu.memory_space<vmem>>, %arg6: memref<128x128xbf16, #tpu.memory_space<vmem>>, %arg7: memref<1x128xf32, #tpu.memory_space<vmem>>, %arg8: memref<112x128xf32, #tpu.memory_space<vmem>>) attributes {dimension_semantics = [#tpu.dimension_semantics<parallel>], iteration_bounds = array<i64: 2>, scalar_prefetch = 0 : i64, scratch_operands = 0 : i64, tpu.core_type = #tpu.core_type<tc>, window_params = [{transform_indices = @transform_0, window_bounds = array<i64: 112, 128>}, {pipeline_mode = #tpu.pipeline_mode<synchronous>, transform_indices = @transform_1, window_bounds = array<i64: 128, 128>}, {pipeline_mode = #tpu.pipeline_mode<synchronous>, transform_indices = @transform_2, window_bounds = array<i64: 1, 128>}, {pipeline_mode = #tpu.pipeline_mode<synchronous>, transform_indices = @transform_3, window_bounds = array<i64: 1, 128>}, {pipeline_mode = #tpu.pipeline_mode<synchronous>, transform_indices = @transform_4, window_bounds = array<i64: 1, 128>}, {pipeline_mode = #tpu.pipeline_mode<synchronous>, transform_indices = @transform_5, window_bounds = array<i64: 128, 128>}, {pipeline_mode = #tpu.pipeline_mode<synchronous>, transform_indices = @transform_6, window_bounds = array<i64: 1, 128>}, {transform_indices = @transform_7, window_bounds = array<i64: 112, 128>}]} {
    %c0 = arith.constant 0 : index
    %c0_0 = arith.constant 0 : index
    %0 = vector.load %arg1[%c0, %c0_0] : memref<112x128xbf16, #tpu.memory_space<vmem>>, vector<112x128xbf16>
    %c0_1 = arith.constant 0 : index
    %c0_2 = arith.constant 0 : index
    %1 = vector.load %arg2[%c0_1, %c0_2] : memref<128x128xbf16, #tpu.memory_space<vmem>>, vector<128x128xbf16>
    %cst = arith.constant dense<0.000000e+00> : vector<112x128xf32>
    %2 = tpu.matmul %0, %1, %cst {dimension_numbers = #tpu.dot_dimension_numbers<[1], [0], [0], [1], [0, 0, 1, 1], [], []>} : vector<112x128xbf16>, vector<128x128xbf16>, vector<112x128xf32> -> vector<112x128xf32>
    %c0_3 = arith.constant 0 : index
    %c0_4 = arith.constant 0 : index
    %3 = vector.load %arg3[%c0_3, %c0_4] : memref<1x128xf32, #tpu.memory_space<vmem>>, vector<1x128xf32>
    %4 = vector.broadcast %3 : vector<1x128xf32> to vector<112x128xf32>
    %5 = arith.addf %2, %4 : vector<112x128xf32>
    %cst_5 = arith.constant dense<0.000000e+00> : vector<112xf32>
    %6 = vector.multi_reduction <add>, %5, %cst_5 [1] : vector<112x128xf32> to vector<112xf32>
    %7 = vector.shape_cast %6 : vector<112xf32> to vector<112x1xf32>
    %8 = arith.mulf %5, %5 : vector<112x128xf32>
    %cst_6 = arith.constant dense<0.000000e+00> : vector<112xf32>
    %9 = vector.multi_reduction <add>, %8, %cst_6 [1] : vector<112x128xf32> to vector<112xf32>
    %10 = vector.shape_cast %9 : vector<112xf32> to vector<112x1xf32>
    %cst_7 = arith.constant 3.125000e-02 : f32
    %11 = vector.broadcast %cst_7 : f32 to vector<112x1xf32>
    %12 = arith.mulf %7, %11 : vector<112x1xf32>
    %cst_8 = arith.constant 3.125000e-02 : f32
    %13 = vector.broadcast %cst_8 : f32 to vector<112x1xf32>
    %14 = arith.mulf %10, %13 : vector<112x1xf32>
    %15 = arith.mulf %12, %12 : vector<112x1xf32>
    %16 = arith.subf %14, %15 : vector<112x1xf32>
    %cst_9 = arith.constant 0.000000e+00 : f32
    %17 = vector.broadcast %cst_9 : f32 to vector<112x1xf32>
    %18 = arith.maximumf %16, %17 : vector<112x1xf32>
    %19 = vector.broadcast %12 : vector<112x1xf32> to vector<112x128xf32>
    %20 = arith.subf %5, %19 : vector<112x128xf32>
    %cst_10 = arith.constant 9.99999974E-6 : f32
    %21 = vector.broadcast %cst_10 : f32 to vector<112x1xf32>
    %22 = arith.addf %18, %21 : vector<112x1xf32>
    %23 = math.rsqrt %22 : vector<112x1xf32>
    %24 = vector.broadcast %23 : vector<112x1xf32> to vector<112x128xf32>
    %25 = arith.mulf %20, %24 : vector<112x128xf32>
    %c0_11 = arith.constant 0 : index
    %c0_12 = arith.constant 0 : index
    %26 = vector.load %arg4[%c0_11, %c0_12] : memref<1x128xf32, #tpu.memory_space<vmem>>, vector<1x128xf32>
    %27 = vector.broadcast %26 : vector<1x128xf32> to vector<112x128xf32>
    %28 = arith.mulf %25, %27 : vector<112x128xf32>
    %c0_13 = arith.constant 0 : index
    %c0_14 = arith.constant 0 : index
    %29 = vector.load %arg5[%c0_13, %c0_14] : memref<1x128xf32, #tpu.memory_space<vmem>>, vector<1x128xf32>
    %30 = vector.broadcast %29 : vector<1x128xf32> to vector<112x128xf32>
    %31 = arith.addf %28, %30 : vector<112x128xf32>
    %cst_15 = arith.constant 0.000000e+00 : f32
    %32 = vector.broadcast %cst_15 : f32 to vector<112x128xf32>
    %33 = arith.maximumf %31, %32 : vector<112x128xf32>
    %34 = arith.truncf %33 : vector<112x128xf32> to vector<112x128xbf16>
    %c0_16 = arith.constant 0 : index
    %c0_17 = arith.constant 0 : index
    %35 = vector.load %arg6[%c0_16, %c0_17] : memref<128x128xbf16, #tpu.memory_space<vmem>>, vector<128x128xbf16>
    %cst_18 = arith.constant dense<0.000000e+00> : vector<112x128xf32>
    %36 = tpu.matmul %34, %35, %cst_18 {dimension_numbers = #tpu.dot_dimension_numbers<[1], [0], [0], [1], [0, 0, 1, 1], [], []>} : vector<112x128xbf16>, vector<128x128xbf16>, vector<112x128xf32> -> vector<112x128xf32>
    %c0_19 = arith.constant 0 : index
    %c0_20 = arith.constant 0 : index
    %37 = vector.load %arg7[%c0_19, %c0_20] : memref<1x128xf32, #tpu.memory_space<vmem>>, vector<1x128xf32>
    %38 = vector.broadcast %37 : vector<1x128xf32> to vector<112x128xf32>
    %39 = arith.addf %36, %38 : vector<112x128xf32>
    %c0_21 = arith.constant 0 : index
    %c0_22 = arith.constant 0 : index
    %40 = vector.load %arg8[%c0_21, %c0_22] : memref<112x128xf32, #tpu.memory_space<vmem>>, vector<112x128xf32>
    tpu.vector_store %arg8[%c0_21, %c0_22], %39 {strides = array<i32>} : memref<112x128xf32, #tpu.memory_space<vmem>>, vector<112x128xf32>,
    return
  }
  func.func @transform_0(%arg0: i32) -> (i32, i32) {
    %c0_i32 = arith.constant 0 : i32
    %c0_i32_0 = arith.constant 0 : i32
    return %arg0, %c0_i32 : i32, i32
  }
  func.func @transform_1(%arg0: i32) -> (i32, i32) {
    %c0_i32 = arith.constant 0 : i32
    %c0_i32_0 = arith.constant 0 : i32
    %c0_i32_1 = arith.constant 0 : i32
    return %c0_i32, %c0_i32_0 : i32, i32
  }
  func.func @transform_2(%arg0: i32) -> (i32, i32) {
    %c0_i32 = arith.constant 0 : i32
    %c0_i32_0 = arith.constant 0 : i32
    %c0_i32_1 = arith.constant 0 : i32
    return %c0_i32, %c0_i32_0 : i32, i32
  }
  func.func @transform_3(%arg0: i32) -> (i32, i32) {
    %c0_i32 = arith.constant 0 : i32
    %c0_i32_0 = arith.constant 0 : i32
    %c0_i32_1 = arith.constant 0 : i32
    return %c0_i32, %c0_i32_0 : i32, i32
  }
  func.func @transform_4(%arg0: i32) -> (i32, i32) {
    %c0_i32 = arith.constant 0 : i32
    %c0_i32_0 = arith.constant 0 : i32
    %c0_i32_1 = arith.constant 0 : i32
    return %c0_i32, %c0_i32_0 : i32, i32
  }
  func.func @transform_5(%arg0: i32) -> (i32, i32) {
    %c0_i32 = arith.constant 0 : i32
    %c0_i32_0 = arith.constant 0 : i32
    %c0_i32_1 = arith.constant 0 : i32
    return %c0_i32, %c0_i32_0 : i32, i32
  }
  func.func @transform_6(%arg0: i32) -> (i32, i32) {
    %c0_i32 = arith.constant 0 : i32
    %c0_i32_0 = arith.constant 0 : i32
    %c0_i32_1 = arith.constant 0 : i32
    return %c0_i32, %c0_i32_0 : i32, i32
  }
  func.func @transform_7(%arg0: i32) -> (i32, i32) {
    %c0_i32 = arith.constant 0 : i32
    %c0_i32_0 = arith.constant 0 : i32
    return %arg0, %c0_i32 : i32, i32
  }
}

</mosaic_0001>

<bundles_post_ra>
// kernel: tpu_custom_call.1
= control target key start
LH: loop header
LB: loop body
LE: loop exit
PB: predicated region body
PF: predicated region fallthrough
CT: control target
= control target key end

     0   :  { %s2091_s0 = inlined_call_operand.hbm [shape: bf16[224,128], index: 0, kind: input, shape index: {}]   ;;  %s2092_s1 = inlined_call_operand.hbm [shape: bf16[128,128], index: 1, kind: input, shape index: {}]   ;;  %s2093_s2 = inlined_call_operand.vmem [shape: f32[1,128], index: 2, kind: input, shape index: {}]   ;;  %s2094_s3 = inlined_call_operand.vmem [shape: f32[1,128], index: 3, kind: input, shape index: {}]   ;;  %s2095_s4 = inlined_call_operand.vmem [shape: f32[1,128], index: 4, kind: input, shape index: {}]   ;;  %s2096_s5 = inlined_call_operand.hbm [shape: bf16[128,128], index: 5, kind: input, shape index: {}]   ;;  %s2097_s6 = inlined_call_operand.vmem [shape: f32[1,128], index: 6, kind: input, shape index: {}]   ;;  %s2098_s7 = inlined_call_operand.hbm [shape: f32[224,128], index: 7, kind: output, shape index: {}]  }
   0x1   :  { %2104 = sst [smem:[#allocation12_spill]] %s2092_s1 }
   0x2   :  { %12 = vsyncpa [#allocation3], 0 }
   0x3   :  { %14 = vsyncpa [#allocation3 + $0x1], 0 }
   0x4   :  { %15 = vsyncpa [#allocation6], 0 }
   0x5   :  { %16 = vsyncpa [#allocation4], 0 }
   0x6   :  { %18 = vsyncpa [#allocation4 + $0x1], 0  ;;  %s1578_s24 = smov 0   ;;  %s1580_s25 = smov 0  }
   0x7   :  { %s1582_s26 = smov 0   ;;  %s1584_s27 = smov 0  }
   0x8 LB: > { %s1599_s28 = sadd.s32 4294967295, %s1526_s27   ;;  %s1084_s29 = sadd.s32 4294967294, %s1526_s27   ;;  %s1526_s27 = sphi %s1584_s27, %s2124_s27   ;;  %s1522_s26 = sphi %s1582_s26, %s2123_s26   ;;  %s1518_s25 = sphi %s1580_s25, %s2122_s25   ;;  %s1514_s24 = sphi %s1578_s24, %s2121_s24  }
   0x9   : > { %p44_p0 = scmp.ne.s32.totalorder %s1518_s25, %s1514_s24  ;;  %p2099_p1 = scmp.eq.s32.totalorder %s1599_s28, 0 }
   0xa   : > { %p200_p3 = scmp.eq.s32.totalorder %s1084_s29, 1  ;;  %p1085_p5 = scmp.ge.s32.totalorder %s1526_s27, 1 }
   0xb   : > { %p1608_p4 = por %p2099_p1, %p44_p0  ;;  %p207_p7 = scmp.lt.s32.totalorder %s1526_s27, 3 }
   0xc   : > { %p1613_p6 = por %p200_p3, %p44_p0  ;;  %s1528_s10 = smov [#allocation5]  }
   0xd   : > { %s2105_s30 = scalar_select %p1608_p4, 1, 0 }
   0xe   : > { %s2106_s8 = scalar_select %p1613_p6, 1, 0 }
   0xf   : > { %p1618_p8 = pnand %p1085_p5, %p207_p7  ;;  %s219_s11 = sshll.u32 %s1528_s10, 4  ;;  %s1622_s11 = int_to_ptr.vmem [resolvable:$true] %s219_s11 }
  0x10   : > { %s1529_s13 = smov [#allocation7]   ;;  %s2109_s1 = sld [smem:[#allocation12_spill]] }
  0x11   : > { %p1258_p9 = pneg %p1618_p8  ;;  %s241_s14 = sshll.u32 %s1529_s13, 4  ;;  %s1633_s14 = int_to_ptr.vmem [resolvable:$true] %s241_s14 }
  0x13   : > { %p1629_p11 = pnand %p1258_p9, %p2099_p1 }
  0x15   : > { %p1372_p13 = pneg %p1629_p11 }
  0x16   : > { %s1370_s17 = scalar_lea.hbm %s2109_s1, 1024 }
  0x17   : > { %p1371_p12 = scmp.ne.s32.totalorder %s2109_s1, %s1370_s17  ;;  %p1377_p5 = scmp.lt.u32.totalorder %s1370_s17, %s2109_s1 }
  0x19   : > { %p1373_p0 = pnand %p1372_p13, %p1371_p12 }
  0x1b   : > { %p1374_p3 = pneg %p1373_p0 }
  0x1d   : > { %p1379_p7 = pnand %p1377_p5, %p1374_p3 }
  0x1f   : > { %1382 = shalt.err (!%p1379_p7)
}
  0x20   : > { %s1383_s22 = scalar_lea.vmem %s1622_s11, 1024  ;;  %p1391_p2 = scmp.lt.s32.totalorder %s1622_s11, %s1622_s11 }
  0x21   : > { %p1384_p9 = scmp.ne.s32.totalorder %s1622_s11, %s1383_s22  ;;  %p1392_p12 = scmp.lt.s32.totalorder %s1383_s22, %s1383_s22 }
  0x23   : > { %p1386_p10 = pnand %p1384_p9, %p1372_p13  ;;  %p1393_p0 = por %p1392_p12, %p1391_p2 }
  0x25   : > { %p1387_p1 = pneg %p1386_p10 }
  0x27   : > { %p1394_p6 = pnand %p1393_p0, %p1387_p1 }
  0x29   : > { %1397 = shalt.err (!%p1394_p6)
}
  0x2a   : > { %s2100_s23 = smov 64   ;;  %s2101_s29 = smov 4  }
  0x2b   : > { %1261 = dma.hbm_to_vmem [thread:$0]  (!%p1629_p11), %s2109_s1, 1024, %s1622_s11, [#allocation6], %s2100_s23, %s2100_s23, %s2101_s29  }
  0x2c   : > { %s1398_s17 = scalar_lea.hbm %s2096_s5, 1024 }
  0x2d   : > { %p1399_p1 = scmp.ne.s32.totalorder %s2096_s5, %s1398_s17  ;;  %p1405_p10 = scmp.lt.u32.totalorder %s1398_s17, %s2096_s5 }
  0x2f   : > { %p1401_p2 = pnand %p1399_p1, %p1372_p13 }
  0x31   : > { %p1402_p6 = pneg %p1401_p2 }
  0x33   : > { %p1407_p3 = pnand %p1405_p10, %p1402_p6 }
  0x35   : > { %1410 = shalt.err (!%p1407_p3)
}
  0x36   : > { %s1411_s11 = scalar_lea.vmem %s1633_s14, 1024  ;;  %p1419_p12 = scmp.lt.s32.totalorder %s1633_s14, %s1633_s14 }
  0x37   : > { %p1412_p5 = scmp.ne.s32.totalorder %s1633_s14, %s1411_s11  ;;  %p1420_p0 = scmp.lt.s32.totalorder %s1411_s11, %s1411_s11 }
  0x39   : > { %p1414_p7 = pnand %p1412_p5, %p1372_p13  ;;  %p1421_p1 = por %p1420_p0, %p1419_p12 }
  0x3b   : > { %p1415_p9 = pneg %p1414_p7 }
  0x3d   : > { %p1422_p2 = pnand %p1421_p1, %p1415_p9 }
  0x3f   : > { %1425 = shalt.err (!%p1422_p2)
}
  0x40   : > { %1264 = dma.hbm_to_vmem [thread:$0]  (!%p1629_p11), %s2096_s5, 1024, %s1633_s14, [#allocation6], %s2100_s23, %s2100_s23, %s2101_s29  }
  0x41   : > { %s1694_s12 = sadd.s32 1, %s1526_s27   ;;  %s31_s13 = sadd.s32 1, %s1522_s26 }
  0x42   : > { %s28_s15 = ssub.s32 %s1526_s27, %s1694_s12  ;;  %p38_p13 = scmp.ne.s32.totalorder %s1522_s26, %s1518_s25 }
  0x43   : > { %p29_p6 = scmp.eq.s32.totalorder %s28_s15, 0  ;;  %p39_p10 = scmp.eq.s32.totalorder %s1526_s27, 0 }
  0x44   : > { %p2110_p3 = scmp.eq.s32.totalorder %s1599_s28, 1  ;;  %p1275_p7 = scmp.lt.s32.totalorder %s1526_s27, 2 }
  0x45   : > { %s1710_s17 = scalar_select %p29_p6, %s1522_s26, %s31_s13  }
  0x46   : > { %p1704_p5 = por %p2110_p3, %p38_p13  ;;  %p40_p9 = por %p39_p10, %p38_p13 }
  0x47   : > { %s258_s18 = sand.u32 1, %s1522_s26   ;;  %s1123_s14 = smul.u32 896, %s1526_s27 }
  0x48   : > { %s2111_s16 = scalar_select %p1704_p5, 1, 0 }
  0x49   : > { %s1243_s19 = smul.u32 56, %s258_s18  ;;  %p1714_p11 = pnand %p1275_p7, %p40_p9 }
  0x4a   : > { %s1721_s22 = scalar_lea.hbm %s2091_s0, %s1123_s14  ;;  %s1725_s15 = scalar_lea.sflag [#allocation3], %s258_s18 }
  0x4b   : > { %s262_s10 = scalar_lea.vmem [#allocation2], %s1243_s19  ;;  %s1426_s23 = scalar_lea.hbm %s1721_s22, 896 }
  0x4c   : > { %s269_s13 = sshll.u32 %s262_s10, 4  ;;  %p1427_p12 = scmp.ne.s32.totalorder %s1721_s22, %s1426_s23  ;;  %s1723_s13 = int_to_ptr.vmem [resolvable:$true] %s269_s13 }
  0x4d   : > { %p1428_p0 = pneg %p1714_p11  ;;  %s1431_s11 = scalar_lea.hbm %s2091_s0, 1792 }
  0x4e   : > { %p1432_p13 = scmp.lt.u32.totalorder %s1721_s22, %s2091_s0  ;;  %p1433_p6 = scmp.lt.u32.totalorder %s1431_s11, %s1426_s23 }
  0x4f   : > { %p1429_p1 = pnand %p1428_p0, %p1427_p12  ;;  %p1435_p3 = scmp.lt.u32.totalorder %s1426_s23, %s1721_s22 }
  0x50   : > { %p1434_p10 = por %p1433_p6, %p1432_p13 }
  0x51   : > { %p1430_p2 = pneg %p1429_p1 }
  0x52   : > { %p1436_p7 = por %p1435_p3, %p1434_p10 }
  0x54   : > { %p1437_p9 = pnand %p1436_p7, %p1430_p2 }
  0x56   : > { %1440 = shalt.err (!%p1437_p9)
}
  0x57   : > { %s1441_s18 = scalar_lea.vmem %s1723_s13, 896  ;;  %s1532_s19 = smov [#allocation2]  }
  0x58   : > { %p1442_p12 = scmp.ne.s32.totalorder %s1723_s13, %s1441_s18  ;;  %s1446_s10 = sshll.u32 %s1532_s19, 4  ;;  %s1447_s10 = int_to_ptr.vmem [resolvable:$false] %s1446_s10 }
  0x59   : > { %s1448_s1 = scalar_lea.vmem %s1447_s10, 1792  ;;  %p1449_p4 = scmp.lt.s32.totalorder %s1723_s13, %s1447_s10 }
  0x5a   : > { %p1444_p1 = pnand %p1442_p12, %p1428_p0  ;;  %p1450_p13 = scmp.lt.s32.totalorder %s1448_s1, %s1441_s18 }
  0x5c   : > { %p1445_p5 = pneg %p1444_p1  ;;  %p1451_p6 = por %p1450_p13, %p1449_p4 }
  0x5e   : > { %p1452_p10 = pnand %p1451_p6, %p1445_p5 }
  0x60   : > { %1455 = shalt.err (!%p1452_p10)
}
  0x61   : > { %s2113_s23 = smov 4   ;;  %s2114_s29 = smov 64  }
  0x62   : > { %1268 = dma.hbm_to_vmem [thread:$0]  (!%p1714_p11), %s1721_s22, 896, %s1723_s13, %s1725_s15, %s2114_s29, %s2114_s29, %s2113_s23  }
  0x63   : > { %281 = sbr.rel (%p1618_p8) target bundleno = 814 (0x32e), region = 48  ;;  %s1759_s14 = sand.u32 (!%p1618_p8), 1, %s1518_s25  }
  0x64   : > { %s1244_s21 = smul.u32 (!%p1618_p8), 56, %s1759_s14  ;;  %s284_s11 = scalar_lea.sflag (!%p1618_p8), [#allocation3], %s1759_s14 }
  0x65   : > { %p2115_p4 = scmp.ne.s32.totalorder (!%p1618_p8), %s2105_s30, 0 }
  0x66   : > { %s1763_s18 = scalar_lea.vmem (!%p1618_p8), [#allocation2], %s1244_s21 }
  0x6a   : > { %1501 = dma.done.wait (%p2115_p4), %s284_s11, 896  }
  0x6b   : > { %1503 = vsyncadd (%p2115_p4), %s284_s11, 4294966400  ;;  %p2116_p5 = scmp.eq.s32.totalorder %s1599_s28, 0 }
  0x6d   : > { %1505 = dma.done.wait (%p2116_p5), [#allocation6], 2048   ;;  %p2117_p8 = pmov %p2116_p5 }
  0x6e   : > { %v1533_v0 = vmov 0.0   ;;  %vm1534_vm0 = vmmov 0   ;;  %v1319_v1 = vld [vmem:[#allocation5] sm:$0xff]   ;;  %v1320_v2 = vld [vmem:[#allocation5 + $0x8] sm:$0xff]   ;;  %v1321_v3 = vld [vmem:[#allocation5 + $0x10] sm:$0xff]   ;;  %s1245_s19 = smul.u32 112, %s1759_s14 }
  0x6f   : > { %1507 = vsyncadd (%p2117_p8), [#allocation6], 4294965248  ;;  %1155 = vmatprep.subr.bf16.mxu0 %v1533_v0  ;;  %1171 = vmatprep.mubr.msk.bf16.mxu0 %vm1534_vm0, %v1533_v0  ;;  %v1322_v4 = vld [vmem:[#allocation5 + $0x18] sm:$0xff]   ;;  %v1323_v5 = vld [vmem:[#allocation5 + $0x20] sm:$0xff]   ;;  %s1124_s29 = smul.u32 1792, %s1599_s28  ;;  %s979_s28 = scalar_lea.sflag [#allocation4], %s1759_s14 }
  0x70   : > { %1199 = vmatprep.subr.bf16.mxu1 %v1533_v0  ;;  %1215 = vmatprep.mubr.msk.bf16.mxu1 %vm1534_vm0, %v1533_v0  ;;  %v1324_v6 = vld [vmem:[#allocation5 + $0x28] sm:$0xff]   ;;  %v1325_v7 = vld [vmem:[#allocation5 + $0x30] sm:$0xff]   ;;  %v1326_v8 = vld [vmem:[#allocation5 + $0x38] sm:$0xff]   ;;  %s2024_s23 = scalar_lea.vmem [#allocation8], %s1245_s19  ;;  %p2118_p0 = scmp.ne.s32.totalorder %s2111_s16, 0 }
  0x71   : > { %1156 = vmatpush3.bf16.msra.mxu0 %v1319_v1  ;;  %v1327_v9 = vld [vmem:[%s1763_s18] sm:$0xff]   ;;  %v1328_v10 = vld [vmem:[%s1763_s18 + $0x8] sm:$0xff]   ;;  %v1329_v11 = vld [vmem:[%s1763_s18 + $0x10] sm:$0xff]   ;;  %s992_s21 = sshll.u32 %s2024_s23, 4  ;;  %s2043_s30 = scalar_lea.hbm %s2098_s7, %s1124_s29  ;;  %s2045_s21 = int_to_ptr.vmem [resolvable:$true] %s992_s21 }
  0x72   : > { %1157 = vmatprep.subr.bf16.mxu0 %v1533_v0  ;;  %v1330_v12 = vld [vmem:[%s1763_s18 + $0x18] sm:$0xff]   ;;  %v1331_v13 = vld [vmem:[%s1763_s18 + $0x20] sm:$0xff]   ;;  %v1332_v14 = vld [vmem:[%s1763_s18 + $0x28] sm:$0xff]   ;;  %s1456_s9 = scalar_lea.vmem %s2045_s21, 1792  ;;  %s1535_s20 = smov [#allocation8]  }
  0x73   : > { %v1333_v15 = vld [vmem:[%s1763_s18 + $0x30] sm:$0xff]   ;;  %v1808_v16 = vld [vmem:[%s2093_s2] ss:$0 sm:$0xff]  ;;  %v1335_v42 = vld [vmem:[#allocation7 + $0x8] sm:$0xff]   ;;  %p1457_p11 = scmp.ne.s32.totalorder %s2045_s21, %s1456_s9  ;;  %s1460_s22 = sshll.u32 %s1535_s20, 4  ;;  %s1461_s22 = int_to_ptr.vmem [resolvable:$false] %s1460_s22 }
  0x74   : > { %v1334_v39 = vld [vmem:[#allocation7] sm:$0xff]   ;;  %v1336_v49 = vld [vmem:[#allocation7 + $0x10] sm:$0xff]   ;;  %v1337_v53 = vld [vmem:[#allocation7 + $0x18] sm:$0xff]   ;;  %s1462_s13 = scalar_lea.vmem %s1461_s22, 3584  ;;  %p1463_p7 = scmp.lt.s32.totalorder %s2045_s21, %s1461_s22 }
  0x75   : > { %1158 = vmatpush3.bf16.msra.mxu0 %v1320_v2  ;;  %1200 = vmatpush3.bf16.msra.mxu1 %v1334_v39  ;;  %v1338_v59 = vld [vmem:[#allocation7 + $0x20] sm:$0xff]   ;;  %v1339_v63 = vld [vmem:[#allocation7 + $0x28] sm:$0xff]   ;;  %p1458_p2 = pnand %p1457_p11, %p2118_p0  ;;  %p1464_p9 = scmp.lt.s32.totalorder %s1462_s13, %s1456_s9 }
  0x76   : > { %1159 = vmatprep.subr.bf16.mxu0 %v1533_v0  ;;  %1201 = vmatprep.subr.bf16.mxu1 %v1533_v0 }
  0x77   : > { %p1459_p3 = pneg %p1458_p2  ;;  %p1465_p12 = por %p1464_p9, %p1463_p7 }
  0x79   : > { %1160 = vmatpush3.bf16.msra.mxu0 %v1321_v3  ;;  %1202 = vmatpush3.bf16.msra.mxu1 %v1335_v42  ;;  %p1466_p1 = pnand %p1465_p12, %p1459_p3 }
  0x7a   : > { %1161 = vmatprep.subr.bf16.mxu0 %v1533_v0  ;;  %1203 = vmatprep.subr.bf16.mxu1 %v1533_v0 }
  0x7d   : > { %1162 = vmatpush3.bf16.msra.mxu0 %v1322_v4  ;;  %1204 = vmatpush3.bf16.msra.mxu1 %v1336_v49 }
  0x7e   : > { %1163 = vmatprep.subr.bf16.mxu0 %v1533_v0  ;;  %1205 = vmatprep.subr.bf16.mxu1 %v1533_v0 }
  0x81   : > { %1164 = vmatpush3.bf16.msra.mxu0 %v1323_v5  ;;  %1206 = vmatpush3.bf16.msra.mxu1 %v1337_v53 }
  0x82   : > { %1165 = vmatprep.subr.bf16.mxu0 %v1533_v0  ;;  %1207 = vmatprep.subr.bf16.mxu1 %v1533_v0 }
  0x85   : > { %1166 = vmatpush3.bf16.msra.mxu0 %v1324_v6  ;;  %1208 = vmatpush3.bf16.msra.mxu1 %v1338_v59  ;;  %v1340_v6 = vld [vmem:[#allocation7 + $0x30] sm:$0xff]  }
  0x86   : > { %1167 = vmatprep.subr.bf16.mxu0 %v1533_v0  ;;  %1209 = vmatprep.subr.bf16.mxu1 %v1533_v0 }
  0x89   : > { %1168 = vmatpush3.bf16.msra.mxu0 %v1325_v7  ;;  %1210 = vmatpush3.bf16.msra.mxu1 %v1339_v63 }
  0x8a   : > { %1169 = vmatprep.subr.bf16.mxu0 %v1533_v0  ;;  %1211 = vmatprep.subr.bf16.mxu1 %v1533_v0 }
  0x8d   : > { %1170 = vmatpush3.bf16.msra.mxu0 %v1326_v8  ;;  %1212 = vmatpush3.bf16.msra.mxu1 %v1340_v6 }
  0x8e   : > { %1213 = vmatprep.subr.bf16.mxu1 %v1533_v0 }
  0x90   : > { %1172 = vmatmul.mubr.bf16.vlgmr.msra.gmra.mrb[0].mxu0 %v1327_v9 }
  0x91   : > { %1175 = vmatprep.mubr.msk.bf16.mxu0 %vm1534_vm0, %v1533_v0 }
  0x98   : > { %1176 = vmatmul.mubr.bf16.gmra.mrb[4].mxu0 %v1328_v10  ;;  %v1341_v10 = vld [vmem:[#allocation7 + $0x38] sm:$0xff]  }
  0x99   : > { %1179 = vmatprep.mubr.msk.bf16.mxu0 %vm1534_vm0, %v1533_v0  ;;  %1214 = vmatpush3.bf16.msra.mxu1 %v1341_v10 }
  0xa0   : > { %1180 = vmatmul.mubr.bf16.gmra.mrb[8].mxu0 %v1329_v11 }
  0xa1   : > { %1183 = vmatprep.mubr.msk.bf16.mxu0 %vm1534_vm0, %v1533_v0 }
  0xa8   : > { %1184 = vmatmul.mubr.bf16.gmra.mrb[12].mxu0 %v1330_v12 }
  0xa9   : > { %1187 = vmatprep.mubr.msk.bf16.mxu0 %vm1534_vm0, %v1533_v0 }
  0xb0   : > { %1188 = vmatmul.mubr.bf16.gmra.mrb[16].mxu0 %v1331_v13 }
  0xb1   : > { %1191 = vmatprep.mubr.msk.bf16.mxu0 %vm1534_vm0, %v1533_v0 }
  0xb8   : > { %1192 = vmatmul.mubr.bf16.gmra.mrb[20].mxu0 %v1332_v14 }
  0xb9   : > { %1195 = vmatprep.mubr.msk.bf16.mxu0 %vm1534_vm0, %v1533_v0 }
  0xc0   : > { %1196 = vmatmul.mubr.bf16.gmra.mrb[24].mxu0 %v1333_v15 }
 0x163   : > { %v490_v17 = vpop.f32.mrb[0].mxu0 }
 0x164   : > { %v1811_v18 = vadd.f32 %v1808_v16, %v490_v17  ;;  %v1173_v19 = vpop.f32.mrb[1].mxu0 }
 0x165   : > { %v493_v20 = vpop.f32.mrb[2].mxu0 }
 0x166   : > { %v1814_v21 = vadd.f32 %v1808_v16, %v493_v20  ;;  %545 = vadd.xlane.f32.xlu0 %v1811_v18  ;;  %v1174_v22 = vpop.f32.mrb[3].mxu0  ;;  %v573_v23 = vmul.f32 %v1811_v18, %v1811_v18 }
 0x168   : > { %587 = vadd.xlane.f32.xlu1 %v573_v23  ;;  %v574_v24 = vmul.f32 %v1814_v21, %v1814_v21 }
 0x16a   : > { %547 = vadd.xlane.f32.xlu0 %v1814_v21 }
 0x16b   : > { %v498_v25 = vpop.f32.mrb[4].mxu0 }
 0x16c   : > { %v1823_v26 = vadd.f32 %v1808_v16, %v498_v25  ;;  %589 = vadd.xlane.f32.xlu1 %v574_v24  ;;  %v1177_v27 = vpop.f32.mrb[5].mxu0 }
 0x16d   : > { %v501_v28 = vpop.f32.mrb[6].mxu0 }
 0x16e   : > { %v1826_v29 = vadd.f32 %v1808_v16, %v501_v28  ;;  %549 = vadd.xlane.f32.xlu0 %v1823_v26  ;;  %v1178_v30 = vpop.f32.mrb[7].mxu0  ;;  %v575_v31 = vmul.f32 %v1823_v26, %v1823_v26 }
 0x170   : > { %551 = vadd.xlane.f32.xlu1 %v1826_v29  ;;  %v576_v32 = vmul.f32 %v1826_v29, %v1826_v29 }
 0x172   : > { %591 = vadd.xlane.f32.xlu0 %v575_v31 }
 0x173   : > { %v506_v33 = vpop.f32.mrb[8].mxu0 }
 0x174   : > { %v1835_v34 = vadd.f32 %v1808_v16, %v506_v33  ;;  %593 = vadd.xlane.f32.xlu1 %v576_v32  ;;  %v1181_v35 = vpop.f32.mrb[9].mxu0 }
 0x175   : > { %v509_v36 = vpop.f32.mrb[10].mxu0 }
 0x176   : > { %v1838_v37 = vadd.f32 %v1808_v16, %v509_v36  ;;  %553 = vadd.xlane.f32.xlu0 %v1835_v34  ;;  %v1182_v38 = vpop.f32.mrb[11].mxu0  ;;  %v577_v40 = vmul.f32 %v1835_v34, %v1835_v34 }
 0x178   : > { %555 = vadd.xlane.f32.xlu1 %v1838_v37  ;;  %v578_v41 = vmul.f32 %v1838_v37, %v1838_v37 }
 0x17a   : > { %595 = vadd.xlane.f32.xlu0 %v577_v40 }
 0x17b   : > { %v514_v43 = vpop.f32.mrb[12].mxu0 }
 0x17c   : > { %v1848_v44 = vadd.f32 %v1808_v16, %v514_v43  ;;  %597 = vadd.xlane.f32.xlu1 %v578_v41  ;;  %v1185_v45 = vpop.f32.mrb[13].mxu0 }
 0x17d   : > { %v517_v46 = vpop.f32.mrb[14].mxu0 }
 0x17e   : > { %v1852_v47 = vadd.f32 %v1808_v16, %v517_v46  ;;  %557 = vadd.xlane.f32.xlu0 %v1848_v44  ;;  %v1186_v48 = vpop.f32.mrb[15].mxu0  ;;  %v579_v50 = vmul.f32 %v1848_v44, %v1848_v44 }
 0x180   : > { %559 = vadd.xlane.f32.xlu1 %v1852_v47  ;;  %v580_v51 = vmul.f32 %v1852_v47, %v1852_v47 }
 0x182   : > { %599 = vadd.xlane.f32.xlu0 %v579_v50 }
 0x183   : > { %v522_v52 = vpop.f32.mrb[16].mxu0 }
 0x184   : > { %v1862_v54 = vadd.f32 %v1808_v16, %v522_v52  ;;  %601 = vadd.xlane.f32.xlu1 %v580_v51  ;;  %v1189_v55 = vpop.f32.mrb[17].mxu0 }
 0x185   : > { %v525_v56 = vpop.f32.mrb[18].mxu0 }
 0x186   : > { %v1865_v57 = vadd.f32 %v1808_v16, %v525_v56  ;;  %561 = vadd.xlane.f32.xlu0 %v1862_v54  ;;  %v1190_v58 = vpop.f32.mrb[19].mxu0  ;;  %v581_v60 = vmul.f32 %v1862_v54, %v1862_v54 }
 0x188   : > { %563 = vadd.xlane.f32.xlu1 %v1865_v57  ;;  %v582_v61 = vmul.f32 %v1865_v57, %v1865_v57 }
 0x18a   : > { %603 = vadd.xlane.f32.xlu0 %v581_v60 }
 0x18b   : > { %v530_v62 = vpop.f32.mrb[20].mxu0 }
 0x18c   : > { %v1876_v1 = vadd.f32 %v1808_v16, %v530_v62  ;;  %605 = vadd.xlane.f32.xlu1 %v582_v61  ;;  %v1193_v2 = vpop.f32.mrb[21].mxu0 }
 0x18d   : > { %v533_v3 = vpop.f32.mrb[22].mxu0 }
 0x18e   : > { %v1879_v4 = vadd.f32 %v1808_v16, %v533_v3  ;;  %565 = vadd.xlane.f32.xlu0 %v1876_v1  ;;  %v1194_v5 = vpop.f32.mrb[23].mxu0  ;;  %v583_v7 = vmul.f32 %v1876_v1, %v1876_v1 }
 0x190   : > { %567 = vadd.xlane.f32.xlu1 %v1879_v4  ;;  %v584_v8 = vmul.f32 %v1879_v4, %v1879_v4 }
 0x192   : > { %607 = vadd.xlane.f32.xlu0 %v583_v7 }
 0x193   : > { %v538_v9 = vpop.f32.mrb[24].mxu0 }
 0x194   : > { %v1890_v11 = vadd.f32 %v1808_v16, %v538_v9  ;;  %609 = vadd.xlane.f32.xlu1 %v584_v8  ;;  %v1197_v12 = vpop.f32.mrb[25].mxu0  ;;  %v1919_v8 = vld [vmem:[%s2094_s3] ss:$0 sm:$0xff] }
 0x195   : > { %v541_v13 = vpop.f32.mrb[26].mxu0 }
 0x196   : > { %v1893_v14 = vadd.f32 %v1808_v16, %v541_v13  ;;  %569 = vadd.xlane.f32.xlu0 %v1890_v11  ;;  %v1198_v15 = vpop.f32.mrb[27].mxu0  ;;  %v585_v17 = vmul.f32 %v1890_v11, %v1890_v11 }
 0x198   : > { %571 = vadd.xlane.f32.xlu1 %v1893_v14  ;;  %v586_v19 = vmul.f32 %v1893_v14, %v1893_v14 }
 0x19a   : > { %611 = vadd.xlane.f32.xlu0 %v585_v17 }
 0x19c   : > { %613 = vadd.xlane.f32.xlu1 %v586_v19 }
 0x1f3   : > { %v546_v20 = vpop.xlane.xlu0 %545 }
 0x1f4   : > { %v615_v22 = vmul.f32 0.03125, %v546_v20 }
 0x1f5   : > { %v588_v23 = vpop.xlane.xlu1 %587 }
 0x1f6   : > { %v643_v24 = vmul.f32 %v615_v22, %v615_v22  ;;  %v629_v25 = vmul.f32 0.03125, %v588_v23  ;;  %v685_v62 = vsub.f32 %v1811_v18, %v615_v22 }
 0x1f7   : > { %v548_v16 = vpop.xlane.xlu0 %547 }
 0x1f8   : > { %v657_v27 = vsub.f32 %v629_v25, %v643_v24  ;;  %v616_v28 = vmul.f32 0.03125, %v548_v16  ;;  %v1930_v25 = vld [vmem:[%s2095_s4] ss:$0 sm:$0xff] }
 0x1f9   : > { %v590_v30 = vpop.xlane.xlu1 %589 }
 0x1fa   : > { %v671_v31 = vmax.f32 %v657_v27, 0.0  ;;  %v644_v32 = vmul.f32 %v616_v28, %v616_v28  ;;  %v630_v33 = vmul.f32 0.03125, %v590_v30  ;;  %v686_v15 = vsub.f32 %v1814_v21, %v616_v28 }
 0x1fb   : > { %v550_v35 = vpop.xlane.xlu0 %549 }
 0x1fc   : > { %v699_v36 = vadd.f32 1e-05, %v671_v31  ;;  %v658_v38 = vsub.f32 %v630_v33, %v644_v32  ;;  %v1901_v39 = vmul.f32 0.03125, %v550_v35 }
 0x1fd   : > { %v552_v40 = vpop.xlane.xlu1 %551 }
 0x1fe   : > { %1342 = vrsqrt.f32 %v699_v36  ;;  %v672_v41 = vmax.f32 %v658_v38, 0.0  ;;  %v1903_v42 = vmul.f32 0.03125, %v552_v40  ;;  %v645_v46 = vmul.f32 %v1901_v39, %v1901_v39 }
 0x1ff   : > { %v592_v43 = vpop.xlane.xlu0 %591  ;;  %v687_v40 = vsub.f32 %v1823_v26, %v1901_v39 }
 0x200   : > { %v700_v45 = vadd.f32 1e-05, %v672_v41  ;;  %v631_v48 = vmul.f32 0.03125, %v592_v43  ;;  %v646_v50 = vmul.f32 %v1903_v42, %v1903_v42 }
 0x201   : > { %v594_v49 = vpop.xlane.xlu1 %593 }
 0x202   : > { %1344 = vrsqrt.f32 %v700_v45  ;;  %v659_v51 = vsub.f32 %v631_v48, %v645_v46  ;;  %v632_v52 = vmul.f32 0.03125, %v594_v49 }
 0x203   : > { %v554_v53 = vpop.xlane.xlu0 %553 }
 0x204   : > { %v673_v55 = vmax.f32 %v659_v51, 0.0  ;;  %v660_v56 = vsub.f32 %v632_v52, %v646_v50  ;;  %v1909_v58 = vmul.f32 0.03125, %v554_v53  ;;  %v688_v50 = vsub.f32 %v1826_v29, %v1903_v42 }
 0x205   : > { %v556_v59 = vpop.xlane.xlu1 %555 }
 0x206   : > { %v701_v60 = vadd.f32 1e-05, %v673_v55  ;;  %v674_v61 = vmax.f32 %v660_v56, 0.0  ;;  %v1912_v63 = vmul.f32 0.03125, %v556_v59  ;;  %v647_v6 = vmul.f32 %v1909_v58, %v1909_v58 }
 0x207   : > { %v596_v2 = vpop.xlane.xlu0 %595 }
 0x208   : > { %v1343_v3 = vpop.eup %1342  ;;  %1346 = vrsqrt.f32 %v701_v60  ;;  %v702_v5 = vadd.f32 1e-05, %v674_v61  ;;  %v633_v7 = vmul.f32 0.03125, %v596_v2  ;;  %v648_v18 = vmul.f32 %v1912_v63, %v1912_v63 }
 0x209   : > { %v598_v9 = vpop.xlane.xlu1 %597  ;;  %v727_v10 = vmul.f32 %v1343_v3, %v685_v62 }
 0x20a   : > { %1348 = vrsqrt.f32 %v702_v5  ;;  %v661_v12 = vsub.f32 %v633_v7, %v647_v6  ;;  %v634_v13 = vmul.f32 0.03125, %v598_v9 }
 0x20b   : > { %v558_v17 = vpop.xlane.xlu0 %557  ;;  %v748_v19 = vmul.f32 %v1919_v8, %v727_v10 }
 0x20c   : > { %v1345_v20 = vpop.eup %1344  ;;  %v675_v22 = vmax.f32 %v661_v12, 0.0  ;;  %v662_v23 = vsub.f32 %v634_v13, %v648_v18  ;;  %v1925_v24 = vmul.f32 0.03125, %v558_v17  ;;  %v689_v12 = vsub.f32 %v1835_v34, %v1909_v58 }
 0x20d   : > { %v560_v16 = vpop.xlane.xlu1 %559  ;;  %v728_v27 = vmul.f32 %v1345_v20, %v686_v15  ;;  %v769_v33 = vadd.f32 %v1930_v25, %v748_v19 }
 0x20e   : > { %v703_v30 = vadd.f32 1e-05, %v675_v22  ;;  %v676_v31 = vmax.f32 %v662_v23, 0.0  ;;  %v1932_v32 = vmul.f32 0.03125, %v560_v16  ;;  %v649_v36 = vmul.f32 %v1925_v24, %v1925_v24 }
 0x20f   : > { %v600_v21 = vpop.xlane.xlu0 %599  ;;  %v749_v28 = vmul.f32 %v1919_v8, %v728_v27  ;;  %v783_v52 = vmax.f32 %v769_v33, 0.0  ;;  %v690_v23 = vsub.f32 %v1838_v37, %v1912_v63 }
 0x210   : > { %1350 = vrsqrt.f32 %v703_v30  ;;  %v704_v35 = vadd.f32 1e-05, %v676_v31  ;;  %v635_v38 = vmul.f32 0.03125, %v600_v21  ;;  %v650_v46 = vmul.f32 %v1932_v32, %v1932_v32 }
 0x211   : > { %v602_v41 = vpop.xlane.xlu1 %601  ;;  %v770_v43 = vadd.f32 %v1930_v25, %v749_v28 }
 0x212   : > { %v1347_v45 = vpop.eup %1346  ;;  %1352 = vrsqrt.f32 %v704_v35  ;;  %v663_v48 = vsub.f32 %v635_v38, %v649_v36  ;;  %v636_v49 = vmul.f32 0.03125, %v602_v41 }
 0x213   : > { %v562_v51 = vpop.xlane.xlu0 %561  ;;  %v784_v53 = vmax.f32 %v770_v43, 0.0  ;;  %v729_v55 = vmul.f32 %v1347_v45, %v687_v40 }
 0x214   : > { %v1349_v56 = vpop.eup %1348  ;;  %v677_v59 = vmax.f32 %v663_v48, 0.0  ;;  %v664_v26 = vsub.f32 %v636_v49, %v650_v46  ;;  %v1945_v39 = vmul.f32 0.03125, %v562_v51 }
 0x215   : > { %v564_v60 = vpop.xlane.xlu1 %563  ;;  %v797_v61 = vpack.c.bf16 %v784_v53, %v783_v52  ;;  %v730_v62 = vmul.f32 %v1349_v56, %v688_v50  ;;  %v750_v2 = vmul.f32 %v1919_v8, %v729_v55  ;;  %v691_v50 = vsub.f32 %v1848_v44, %v1925_v24 }
 0x216   : > { %v705_v3 = vadd.f32 1e-05, %v677_v59  ;;  %v678_v5 = vmax.f32 %v664_v26, 0.0  ;;  %v1948_v6 = vmul.f32 0.03125, %v564_v60  ;;  %v651_v10 = vmul.f32 %v1945_v39, %v1945_v39 }
 0x217   : > { %1216 = vmatmul.mubr.bf16.vlgmr.msra.gmra.mrb[0].mxu1 %v797_v61  ;;  %v604_v29 = vpop.xlane.xlu0 %603  ;;  %v751_v42 = vmul.f32 %v1919_v8, %v730_v62  ;;  %v771_v7 = vadd.f32 %v1930_v25, %v750_v2  ;;  %v692_v26 = vsub.f32 %v1852_v47, %v1932_v32 }
 0x218   : > { %1354 = vrsqrt.f32 %v705_v3  ;;  %v706_v9 = vadd.f32 1e-05, %v678_v5  ;;  %v637_v18 = vmul.f32 0.03125, %v604_v29  ;;  %1219 = vmatprep.mubr.msk.bf16.mxu1 %vm1534_vm0, %v1533_v0  ;;  %v652_v19 = vmul.f32 %v1948_v6, %v1948_v6 }
 0x219   : > { %v606_v13 = vpop.xlane.xlu1 %605  ;;  %v772_v15 = vadd.f32 %v1930_v25, %v751_v42  ;;  %v785_v27 = vmax.f32 %v771_v7, 0.0 }
 0x21a   : > { %v1351_v17 = vpop.eup %1350  ;;  %1356 = vrsqrt.f32 %v706_v9  ;;  %v665_v20 = vsub.f32 %v637_v18, %v651_v10  ;;  %v638_v22 = vmul.f32 0.03125, %v606_v13 }
 0x21b   : > { %v566_v16 = vpop.xlane.xlu0 %565  ;;  %v786_v30 = vmax.f32 %v772_v15, 0.0  ;;  %v731_v31 = vmul.f32 %v1351_v17, %v689_v12 }
 0x21c   : > { %v1353_v21 = vpop.eup %1352  ;;  %v679_v28 = vmax.f32 %v665_v20, 0.0  ;;  %v666_v34 = vsub.f32 %v638_v22, %v652_v19  ;;  %v1963_v58 = vmul.f32 0.03125, %v566_v16  ;;  %v693_v20 = vsub.f32 %v1862_v54, %v1945_v39 }
 0x21d   : > { %v568_v33 = vpop.xlane.xlu1 %567  ;;  %v798_v35 = vpack.c.bf16 %v786_v30, %v785_v27  ;;  %v732_v36 = vmul.f32 %v1353_v21, %v690_v23  ;;  %v752_v38 = vmul.f32 %v1919_v8, %v731_v31  ;;  %v694_v21 = vsub.f32 %v1865_v57, %v1948_v6 }
 0x21e   : > { %v707_v40 = vadd.f32 1e-05, %v679_v28  ;;  %v680_v41 = vmax.f32 %v666_v34, 0.0  ;;  %v1966_v43 = vmul.f32 0.03125, %v568_v33  ;;  %v653_v48 = vmul.f32 %v1963_v58, %v1963_v58 }
 0x21f   : > { %1220 = vmatmul.mubr.bf16.gmra.mrb[4].mxu1 %v798_v35  ;;  %v608_v37 = vpop.xlane.xlu0 %607  ;;  %v753_v63 = vmul.f32 %v1919_v8, %v732_v36  ;;  %v773_v45 = vadd.f32 %v1930_v25, %v752_v38  ;;  %v695_v57 = vsub.f32 %v1876_v1, %v1963_v58 }
 0x220   : > { %1358 = vrsqrt.f32 %v707_v40  ;;  %v708_v46 = vadd.f32 1e-05, %v680_v41  ;;  %v639_v49 = vmul.f32 0.03125, %v608_v37  ;;  %1223 = vmatprep.mubr.msk.bf16.mxu1 %vm1534_vm0, %v1533_v0  ;;  %v654_v55 = vmul.f32 %v1966_v43, %v1966_v43 }
 0x221   : > { %v610_v51 = vpop.xlane.xlu1 %609  ;;  %v774_v52 = vadd.f32 %v1930_v25, %v753_v63  ;;  %v787_v61 = vmax.f32 %v773_v45, 0.0 }
 0x222   : > { %v1355_v53 = vpop.eup %1354  ;;  %1360 = vrsqrt.f32 %v708_v46  ;;  %v667_v56 = vsub.f32 %v639_v49, %v653_v48  ;;  %v640_v59 = vmul.f32 0.03125, %v610_v51  ;;  %v696_v49 = vsub.f32 %v1879_v4, %v1966_v43 }
 0x223   : > { %v570_v60 = vpop.xlane.xlu0 %569  ;;  %v788_v62 = vmax.f32 %v774_v52, 0.0  ;;  %v733_v2 = vmul.f32 %v1355_v53, %v691_v50 }
 0x224   : > { %v1357_v3 = vpop.eup %1356  ;;  %v681_v5 = vmax.f32 %v667_v56, 0.0  ;;  %v668_v44 = vsub.f32 %v640_v59, %v654_v55  ;;  %v1981_v24 = vmul.f32 0.03125, %v570_v60 }
 0x225   : > { %v572_v29 = vpop.xlane.xlu1 %571  ;;  %v799_v42 = vpack.c.bf16 %v788_v62, %v787_v61  ;;  %v734_v7 = vmul.f32 %v1357_v3, %v692_v26  ;;  %v754_v9 = vmul.f32 %v1919_v8, %v733_v2 }
 0x226   : > { %v709_v10 = vadd.f32 1e-05, %v681_v5  ;;  %v682_v18 = vmax.f32 %v668_v44, 0.0  ;;  %v628_v12 = vmul.f32 0.03125, %v572_v29  ;;  %v655_v17 = vmul.f32 %v1981_v24, %v1981_v24 }
 0x227   : > { %1224 = vmatmul.mubr.bf16.gmra.mrb[8].mxu1 %v799_v42  ;;  %v612_v13 = vpop.xlane.xlu0 %611  ;;  %v755_v47 = vmul.f32 %v1919_v8, %v734_v7  ;;  %v775_v32 = vadd.f32 %v1930_v25, %v754_v9  ;;  %v697_v58 = vsub.f32 %v1890_v11, %v1981_v24 }
 0x228   : > { %1362 = vrsqrt.f32 %v709_v10  ;;  %v710_v15 = vadd.f32 1e-05, %v682_v18  ;;  %v641_v19 = vmul.f32 0.03125, %v612_v13  ;;  %1227 = vmatprep.mubr.msk.bf16.mxu1 %vm1534_vm0, %v1533_v0  ;;  %v656_v27 = vmul.f32 %v628_v12, %v628_v12  ;;  %v1111_v10 = vld [vmem:[%s2097_s6] ss:$0 sm:$0xff] }
 0x229   : > { %v614_v22 = vpop.xlane.xlu1 %613  ;;  %v776_v23 = vadd.f32 %v1930_v25, %v755_v47  ;;  %v789_v28 = vmax.f32 %v775_v32, 0.0  ;;  %v698_v60 = vsub.f32 %v1893_v14, %v628_v12 }
 0x22a   : > { %v1359_v16 = vpop.eup %1358  ;;  %1364 = vrsqrt.f32 %v710_v15  ;;  %v669_v30 = vsub.f32 %v641_v19, %v655_v17  ;;  %v642_v31 = vmul.f32 0.03125, %v614_v22 }
 0x22b   : > { %v790_v34 = vmax.f32 %v776_v23, 0.0  ;;  %v735_v33 = vmul.f32 %v1359_v16, %v693_v20 }
 0x22c   : > { %v1361_v35 = vpop.eup %1360  ;;  %v683_v36 = vmax.f32 %v669_v30, 0.0  ;;  %v670_v38 = vsub.f32 %v642_v31, %v656_v27 }
 0x22d   : > { %v800_v40 = vpack.c.bf16 %v790_v34, %v789_v28  ;;  %v736_v41 = vmul.f32 %v1361_v35, %v694_v21  ;;  %v756_v54 = vmul.f32 %v1919_v8, %v735_v33 }
 0x22e   : > { %v711_v39 = vadd.f32 1e-05, %v683_v36  ;;  %v684_v37 = vmax.f32 %v670_v38, 0.0 }
 0x22f   : > { %1228 = vmatmul.mubr.bf16.gmra.mrb[12].mxu1 %v800_v40  ;;  %v757_v63 = vmul.f32 %v1919_v8, %v736_v41  ;;  %v777_v45 = vadd.f32 %v1930_v25, %v756_v54 }
 0x230   : > { %1366 = vrsqrt.f32 %v711_v39  ;;  %v712_v46 = vadd.f32 1e-05, %v684_v37  ;;  %1231 = vmatprep.mubr.msk.bf16.mxu1 %vm1534_vm0, %v1533_v0 }
 0x231   : > { %v778_v6 = vadd.f32 %v1930_v25, %v757_v63  ;;  %v791_v50 = vmax.f32 %v777_v45, 0.0 }
 0x232   : > { %v1363_v48 = vpop.eup %1362  ;;  %1368 = vrsqrt.f32 %v712_v46 }
 0x233   : > { %v792_v51 = vmax.f32 %v778_v6, 0.0  ;;  %v737_v52 = vmul.f32 %v1363_v48, %v695_v57 }
 0x234   : > { %v1365_v53 = vpop.eup %1364 }
 0x235   : > { %v801_v55 = vpack.c.bf16 %v792_v51, %v791_v50  ;;  %v738_v56 = vmul.f32 %v1365_v53, %v696_v49  ;;  %v758_v59 = vmul.f32 %v1919_v8, %v737_v52 }
 0x237   : > { %1232 = vmatmul.mubr.bf16.gmra.mrb[16].mxu1 %v801_v55  ;;  %v759_v26 = vmul.f32 %v1919_v8, %v738_v56  ;;  %v779_v1 = vadd.f32 %v1930_v25, %v758_v59 }
 0x238   : > { %1235 = vmatprep.mubr.msk.bf16.mxu1 %vm1534_vm0, %v1533_v0 }
 0x239   : > { %v780_v4 = vadd.f32 %v1930_v25, %v759_v26  ;;  %v793_v61 = vmax.f32 %v779_v1, 0.0 }
 0x23a   : > { %v1367_v43 = vpop.eup %1366 }
 0x23b   : > { %v794_v62 = vmax.f32 %v780_v4, 0.0  ;;  %v739_v2 = vmul.f32 %v1367_v43, %v697_v58 }
 0x23c   : > { %v1369_v3 = vpop.eup %1368 }
 0x23d   : > { %v802_v5 = vpack.c.bf16 %v794_v62, %v793_v61  ;;  %v740_v44 = vmul.f32 %v1369_v3, %v698_v60  ;;  %v760_v29 = vmul.f32 %v1919_v8, %v739_v2 }
 0x23f   : > { %1236 = vmatmul.mubr.bf16.gmra.mrb[20].mxu1 %v802_v5  ;;  %v761_v42 = vmul.f32 %v1919_v8, %v740_v44  ;;  %v781_v7 = vadd.f32 %v1930_v25, %v760_v29 }
 0x240   : > { %1239 = vmatprep.mubr.msk.bf16.mxu1 %vm1534_vm0, %v1533_v0 }
 0x241   : > { %v782_v11 = vadd.f32 %v1930_v25, %v761_v42  ;;  %v795_v14 = vmax.f32 %v781_v7, 0.0 }
 0x243   : > { %v796_v24 = vmax.f32 %v782_v11, 0.0 }
 0x245   : > { %v803_v9 = vpack.c.bf16 %v796_v24, %v795_v14 }
 0x247   : > { %1240 = vmatmul.mubr.bf16.gmra.mrb[24].mxu1 %v803_v9 }
 0x2ea   : > { %v909_v18 = vpop.f32.mrb[0].mxu1 }
 0x2eb   : > { %v910_v12 = vadd.f32 %v1111_v10, %v909_v18  ;;  %v1217_v13 = vpop.f32.mrb[1].mxu1 }
 0x2ec   : > { %v912_v8 = vpop.f32.mrb[2].mxu1 }
 0x2ed   : > { %964 = vst [vmem:[%s2024_s23] sm:$0xff] %v910_v12  ;;  %v913_v0 = vadd.f32 %v1111_v10, %v912_v8  ;;  %v1218_v25 = vpop.f32.mrb[3].mxu1 }
 0x2ef   : > { %965 = vst [vmem:[%s2024_s23 + $0x8] sm:$0xff] %v913_v0 }
 0x2f2   : > { %v917_v47 = vpop.f32.mrb[4].mxu1 }
 0x2f3   : > { %v918_v32 = vadd.f32 %v1111_v10, %v917_v47  ;;  %v1221_v15 = vpop.f32.mrb[5].mxu1 }
 0x2f4   : > { %v920_v17 = vpop.f32.mrb[6].mxu1 }
 0x2f5   : > { %966 = vst [vmem:[%s2024_s23 + $0x10] sm:$0xff] %v918_v32  ;;  %v921_v19 = vadd.f32 %v1111_v10, %v920_v17  ;;  %v1222_v20 = vpop.f32.mrb[7].mxu1 }
 0x2f7   : > { %967 = vst [vmem:[%s2024_s23 + $0x18] sm:$0xff] %v921_v19 }
 0x2fa   : > { %v925_v22 = vpop.f32.mrb[8].mxu1 }
 0x2fb   : > { %v926_v23 = vadd.f32 %v1111_v10, %v925_v22  ;;  %v1225_v16 = vpop.f32.mrb[9].mxu1 }
 0x2fc   : > { %v928_v27 = vpop.f32.mrb[10].mxu1 }
 0x2fd   : > { %968 = vst [vmem:[%s2024_s23 + $0x20] sm:$0xff] %v926_v23  ;;  %v929_v30 = vadd.f32 %v1111_v10, %v928_v27  ;;  %v1226_v31 = vpop.f32.mrb[11].mxu1 }
 0x2ff   : > { %969 = vst [vmem:[%s2024_s23 + $0x28] sm:$0xff] %v929_v30 }
 0x302   : > { %v933_v21 = vpop.f32.mrb[12].mxu1 }
 0x303   : > { %v934_v28 = vadd.f32 %v1111_v10, %v933_v21  ;;  %v1229_v34 = vpop.f32.mrb[13].mxu1 }
 0x304   : > { %v936_v33 = vpop.f32.mrb[14].mxu1 }
 0x305   : > { %970 = vst [vmem:[%s2024_s23 + $0x30] sm:$0xff] %v934_v28  ;;  %v937_v35 = vadd.f32 %v1111_v10, %v936_v33  ;;  %v1230_v36 = vpop.f32.mrb[15].mxu1 }
 0x307   : > { %971 = vst [vmem:[%s2024_s23 + $0x38] sm:$0xff] %v937_v35 }
 0x30a   : > { %v941_v38 = vpop.f32.mrb[16].mxu1 }
 0x30b   : > { %v942_v40 = vadd.f32 %v1111_v10, %v941_v38  ;;  %v1233_v41 = vpop.f32.mrb[17].mxu1 }
 0x30c   : > { %v944_v54 = vpop.f32.mrb[18].mxu1 }
 0x30d   : > { %972 = vst [vmem:[%s2024_s23 + $0x40] sm:$0xff] %v942_v40  ;;  %v945_v39 = vadd.f32 %v1111_v10, %v944_v54  ;;  %v1234_v37 = vpop.f32.mrb[19].mxu1 }
 0x30f   : > { %973 = vst [vmem:[%s2024_s23 + $0x48] sm:$0xff] %v945_v39 }
 0x312   : > { %v949_v63 = vpop.f32.mrb[20].mxu1 }
 0x313   : > { %v950_v45 = vadd.f32 %v1111_v10, %v949_v63  ;;  %v1237_v46 = vpop.f32.mrb[21].mxu1 }
 0x314   : > { %v952_v57 = vpop.f32.mrb[22].mxu1 }
 0x315   : > { %974 = vst [vmem:[%s2024_s23 + $0x50] sm:$0xff] %v950_v45  ;;  %v953_v6 = vadd.f32 %v1111_v10, %v952_v57  ;;  %v1238_v48 = vpop.f32.mrb[23].mxu1 }
 0x317   : > { %975 = vst [vmem:[%s2024_s23 + $0x58] sm:$0xff] %v953_v6 }
 0x31a   : > { %v957_v49 = vpop.f32.mrb[24].mxu1 }
 0x31b   : > { %v958_v50 = vadd.f32 %v1111_v10, %v957_v49  ;;  %v1241_v51 = vpop.f32.mrb[25].mxu1 }
 0x31c   : > { %v960_v52 = vpop.f32.mrb[26].mxu1 }
 0x31d   : > { %976 = vst [vmem:[%s2024_s23 + $0x60] sm:$0xff] %v958_v50  ;;  %v961_v53 = vadd.f32 %v1111_v10, %v960_v52  ;;  %v1242_v55 = vpop.f32.mrb[27].mxu1 }
 0x31f   : > { %977 = vst [vmem:[%s2024_s23 + $0x68] sm:$0xff] %v961_v53 }
 0x320   : > { %1469 = shalt.err (!%p1466_p1)
}
 0x321   : > { %s1470_s15 = scalar_lea.hbm %s2043_s30, 1792  ;;  %s1474_s1 = scalar_lea.hbm %s2098_s7, 3584 }
 0x322   : > { %p1471_p13 = scmp.ne.s32.totalorder %s2043_s30, %s1470_s15  ;;  %p1475_p4 = scmp.lt.u32.totalorder %s2043_s30, %s2098_s7 }
 0x323   : > { %p1476_p5 = scmp.lt.u32.totalorder %s1474_s1, %s1470_s15  ;;  %p1478_p11 = scmp.lt.u32.totalorder %s1470_s15, %s2043_s30 }
 0x324   : > { %p1472_p6 = pnand %p1471_p13, %p2118_p0 }
 0x325   : > { %p1477_p8 = por %p1476_p5, %p1475_p4 }
 0x326   : > { %p1473_p10 = pneg %p1472_p6 }
 0x327   : > { %p1479_p2 = por %p1478_p11, %p1477_p8 }
 0x329   : > { %p1480_p3 = pnand %p1479_p2, %p1473_p10 }
 0x32b   : > { %1483 = shalt.err (!%p1480_p3)
}
 0x32c   : > { %s1536_s11 = smov 128   ;;  %s1537_s18 = smov 8  }
 0x32d   : > { %1256 = dma.vmem_to_hbm [thread:$0]  (%p2118_p0), %s2045_s21, 1792, %s2043_s30, %s979_s28, %s1536_s11, %s1536_s11, %s1537_s18  }
 0x32e PF: > { %s1007_s9 = sand.u32 1, %s1514_s24   ;;  %p2119_p7 = scmp.ne.s32.totalorder %s2106_s8, 0 }
 0x32f   : > { %p2120_p9 = scmp.ge.s32.totalorder %s1526_s27, 2  ;;  %s1008_s20 = scalar_lea.sflag [#allocation4], %s1007_s9 }
 0x331   : > { %p1270_p12 = pnand %p2120_p9, %p2119_p7 }
 0x333   : > { %1509 = dma.done.wait (!%p1270_p12), %s1008_s20, 1792  }
 0x334   : > { %1511 = vsyncadd (!%p1270_p12), %s1008_s20, 4294965504  ;;  %p21_p1 = scmp.ge.s32.totalorder %s1694_s12, 4   ;;  %s2121_s24 = smov %s1518_s25 }
 0x335   : > { %s2122_s25 = smov %s1522_s26  ;;  %s2123_s26 = smov %s1710_s17 }
 0x336   : > { %s2124_s27 = smov %s1694_s12  ;;  %23 = sbr.rel (!%p21_p1) target bundleno = 8 (0x8), region = 101 }
 0x33d   :  { %1013 = vsyncpa [#allocation3], 1 }
 0x33e   :  { %1015 = vsyncpa [#allocation3 + $0x1], 1 }
 0x33f   :  { %1016 = vsyncpa [#allocation6], 1 }
 0x340   :  { %1017 = vsyncpa [#allocation4], 1 }
 0x341   :  { %1019 = vsyncpa [#allocation4 + $0x1], 1 }

// kernel: tpu_custom_call.1
= control target key start
LH: loop header
LB: loop body
LE: loop exit
PB: predicated region body
PF: predicated region fallthrough
CT: control target
= control target key end

     0   :  { %s2091_s0 = inlined_call_operand.hbm [shape: bf16[224,128], index: 0, kind: input, shape index: {}]   ;;  %s2092_s1 = inlined_call_operand.hbm [shape: bf16[128,128], index: 1, kind: input, shape index: {}]   ;;  %s2093_s2 = inlined_call_operand.vmem [shape: f32[1,128], index: 2, kind: input, shape index: {}]   ;;  %s2094_s3 = inlined_call_operand.vmem [shape: f32[1,128], index: 3, kind: input, shape index: {}]   ;;  %s2095_s4 = inlined_call_operand.vmem [shape: f32[1,128], index: 4, kind: input, shape index: {}]   ;;  %s2096_s5 = inlined_call_operand.hbm [shape: bf16[128,128], index: 5, kind: input, shape index: {}]   ;;  %s2097_s6 = inlined_call_operand.vmem [shape: f32[1,128], index: 6, kind: input, shape index: {}]   ;;  %s2098_s7 = inlined_call_operand.hbm [shape: f32[224,128], index: 7, kind: output, shape index: {}]  }
   0x1   :  { %2104 = sst [smem:[#allocation12_spill]] %s2092_s1 }
   0x2   :  { %12 = vsyncpa [#allocation3], 0 }
   0x3   :  { %14 = vsyncpa [#allocation3 + $0x1], 0 }
   0x4   :  { %15 = vsyncpa [#allocation6], 0 }
   0x5   :  { %16 = vsyncpa [#allocation4], 0 }
   0x6   :  { %18 = vsyncpa [#allocation4 + $0x1], 0  ;;  %s1578_s24 = smov 0   ;;  %s1580_s25 = smov 0  }
   0x7   :  { %s1582_s26 = smov 0   ;;  %s1584_s27 = smov 0  }
   0x8 LB: > { %s1599_s28 = sadd.s32 4294967295, %s1526_s27   ;;  %s1084_s29 = sadd.s32 4294967294, %s1526_s27   ;;  %s1526_s27 = sphi %s1584_s27, %s2124_s27   ;;  %s1522_s26 = sphi %s1582_s26, %s2123_s26   ;;  %s1518_s25 = sphi %s1580_s25, %s2122_s25   ;;  %s1514_s24 = sphi %s1578_s24, %s2121_s24  }
   0x9   : > { %p44_p0 = scmp.ne.s32.totalorder %s1518_s25, %s1514_s24  ;;  %p2099_p1 = scmp.eq.s32.totalorder %s1599_s28, 0 }
   0xa   : > { %p200_p3 = scmp.eq.s32.totalorder %s1084_s29, 1  ;;  %p1085_p5 = scmp.ge.s32.totalorder %s1526_s27, 1 }
   0xb   : > { %p1608_p4 = por %p2099_p1, %p44_p0  ;;  %p207_p7 = scmp.lt.s32.totalorder %s1526_s27, 3 }
   0xc   : > { %p1613_p6 = por %p200_p3, %p44_p0  ;;  %s1528_s10 = smov [#allocation5]  }
   0xd   : > { %s2105_s30 = scalar_select %p1608_p4, 1, 0 }
   0xe   : > { %s2106_s8 = scalar_select %p1613_p6, 1, 0 }
   0xf   : > { %p1618_p8 = pnand %p1085_p5, %p207_p7  ;;  %s219_s11 = sshll.u32 %s1528_s10, 4  ;;  %s1622_s11 = int_to_ptr.vmem [resolvable:$true] %s219_s11 }
  0x10   : > { %s1529_s13 = smov [#allocation7]   ;;  %s2109_s1 = sld [smem:[#allocation12_spill]] }
  0x11   : > { %p1258_p9 = pneg %p1618_p8  ;;  %s241_s14 = sshll.u32 %s1529_s13, 4  ;;  %s1633_s14 = int_to_ptr.vmem [resolvable:$true] %s241_s14 }
  0x13   : > { %p1629_p11 = pnand %p1258_p9, %p2099_p1 }
  0x15   : > { %p1372_p13 = pneg %p1629_p11 }
  0x16   : > { %s1370_s17 = scalar_lea.hbm %s2109_s1, 1024 }
  0x17   : > { %p1371_p12 = scmp.ne.s32.totalorder %s2109_s1, %s1370_s17  ;;  %p1377_p5 = scmp.lt.u32.totalorder %s1370_s17, %s2109_s1 }
  0x19   : > { %p1373_p0 = pnand %p1372_p13, %p1371_p12 }
  0x1b   : > { %p1374_p3 = pneg %p1373_p0 }
  0x1d   : > { %p1379_p7 = pnand %p1377_p5, %p1374_p3 }
  0x1f   : > { %1382 = shalt.err (!%p1379_p7)
}
  0x20   : > { %s1383_s22 = scalar_lea.vmem %s1622_s11, 1024  ;;  %p1391_p2 = scmp.lt.s32.totalorder %s1622_s11, %s1622_s11 }
  0x21   : > { %p1384_p9 = scmp.ne.s32.totalorder %s1622_s11, %s1383_s22  ;;  %p1392_p12 = scmp.lt.s32.totalorder %s1383_s22, %s1383_s22 }
  0x23   : > { %p1386_p10 = pnand %p1384_p9, %p1372_p13  ;;  %p1393_p0 = por %p1392_p12, %p1391_p2 }
  0x25   : > { %p1387_p1 = pneg %p1386_p10 }
  0x27   : > { %p1394_p6 = pnand %p1393_p0, %p1387_p1 }
  0x29   : > { %1397 = shalt.err (!%p1394_p6)
}
  0x2a   : > { %s2100_s23 = smov 64   ;;  %s2101_s29 = smov 4  }
  0x2b   : > { %1261 = dma.hbm_to_vmem [thread:$0]  (!%p1629_p11), %s2109_s1, 1024, %s1622_s11, [#allocation6], %s2100_s23, %s2100_s23, %s2101_s29  }
  0x2c   : > { %s1398_s17 = scalar_lea.hbm %s2096_s5, 1024 }
  0x2d   : > { %p1399_p1 = scmp.ne.s32.totalorder %s2096_s5, %s1398_s17  ;;  %p1405_p10 = scmp.lt.u32.totalorder %s1398_s17, %s2096_s5 }
  0x2f   : > { %p1401_p2 = pnand %p1399_p1, %p1372_p13 }
  0x31   : > { %p1402_p6 = pneg %p1401_p2 }
  0x33   : > { %p1407_p3 = pnand %p1405_p10, %p1402_p6 }
  0x35   : > { %1410 = shalt.err (!%p1407_p3)
}
  0x36   : > { %s1411_s11 = scalar_lea.vmem %s1633_s14, 1024  ;;  %p1419_p12 = scmp.lt.s32.totalorder %s1633_s14, %s1633_s14 }
  0x37   : > { %p1412_p5 = scmp.ne.s32.totalorder %s1633_s14, %s1411_s11  ;;  %p1420_p0 = scmp.lt.s32.totalorder %s1411_s11, %s1411_s11 }
  0x39   : > { %p1414_p7 = pnand %p1412_p5, %p1372_p13  ;;  %p1421_p1 = por %p1420_p0, %p1419_p12 }
  0x3b   : > { %p1415_p9 = pneg %p1414_p7 }
  0x3d   : > { %p1422_p2 = pnand %p1421_p1, %p1415_p9 }
  0x3f   : > { %1425 = shalt.err (!%p1422_p2)
}
  0x40   : > { %1264 = dma.hbm_to_vmem [thread:$0]  (!%p1629_p11), %s2096_s5, 1024, %s1633_s14, [#allocation6], %s2100_s23, %s2100_s23, %s2101_s29  }
  0x41   : > { %s1694_s12 = sadd.s32 1, %s1526_s27   ;;  %s31_s13 = sadd.s32 1, %s1522_s26 }
  0x42   : > { %s28_s15 = ssub.s32 %s1526_s27, %s1694_s12  ;;  %p38_p13 = scmp.ne.s32.totalorder %s1522_s26, %s1518_s25 }
  0x43   : > { %p29_p6 = scmp.eq.s32.totalorder %s28_s15, 0  ;;  %p39_p10 = scmp.eq.s32.totalorder %s1526_s27, 0 }
  0x44   : > { %p2110_p3 = scmp.eq.s32.totalorder %s1599_s28, 1  ;;  %p1275_p7 = scmp.lt.s32.totalorder %s1526_s27, 2 }
  0x45   : > { %s1710_s17 = scalar_select %p29_p6, %s1522_s26, %s31_s13  }
  0x46   : > { %p1704_p5 = por %p2110_p3, %p38_p13  ;;  %p40_p9 = por %p39_p10, %p38_p13 }
  0x47   : > { %s258_s18 = sand.u32 1, %s1522_s26   ;;  %s1123_s14 = smul.u32 896, %s1526_s27 }
  0x48   : > { %s2111_s16 = scalar_select %p1704_p5, 1, 0 }
  0x49   : > { %s1243_s19 = smul.u32 56, %s258_s18  ;;  %p1714_p11 = pnand %p1275_p7, %p40_p9 }
  0x4a   : > { %s1721_s22 = scalar_lea.hbm %s2091_s0, %s1123_s14  ;;  %s1725_s15 = scalar_lea.sflag [#allocation3], %s258_s18 }
  0x4b   : > { %s262_s10 = scalar_lea.vmem [#allocation2], %s1243_s19  ;;  %s1426_s23 = scalar_lea.hbm %s1721_s22, 896 }
  0x4c   : > { %s269_s13 = sshll.u32 %s262_s10, 4  ;;  %p1427_p12 = scmp.ne.s32.totalorder %s1721_s22, %s1426_s23  ;;  %s1723_s13 = int_to_ptr.vmem [resolvable:$true] %s269_s13 }
  0x4d   : > { %p1428_p0 = pneg %p1714_p11  ;;  %s1431_s11 = scalar_lea.hbm %s2091_s0, 1792 }
  0x4e   : > { %p1432_p13 = scmp.lt.u32.totalorder %s1721_s22, %s2091_s0  ;;  %p1433_p6 = scmp.lt.u32.totalorder %s1431_s11, %s1426_s23 }
  0x4f   : > { %p1429_p1 = pnand %p1428_p0, %p1427_p12  ;;  %p1435_p3 = scmp.lt.u32.totalorder %s1426_s23, %s1721_s22 }
  0x50   : > { %p1434_p10 = por %p1433_p6, %p1432_p13 }
  0x51   : > { %p1430_p2 = pneg %p1429_p1 }
  0x52   : > { %p1436_p7 = por %p1435_p3, %p1434_p10 }
  0x54   : > { %p1437_p9 = pnand %p1436_p7, %p1430_p2 }
  0x56   : > { %1440 = shalt.err (!%p1437_p9)
}
  0x57   : > { %s1441_s18 = scalar_lea.vmem %s1723_s13, 896  ;;  %s1532_s19 = smov [#allocation2]  }
  0x58   : > { %p1442_p12 = scmp.ne.s32.totalorder %s1723_s13, %s1441_s18  ;;  %s1446_s10 = sshll.u32 %s1532_s19, 4  ;;  %s1447_s10 = int_to_ptr.vmem [resolvable:$false] %s1446_s10 }
  0x59   : > { %s1448_s1 = scalar_lea.vmem %s1447_s10, 1792  ;;  %p1449_p4 = scmp.lt.s32.totalorder %s1723_s13, %s1447_s10 }
  0x5a   : > { %p1444_p1 = pnand %p1442_p12, %p1428_p0  ;;  %p1450_p13 = scmp.lt.s32.totalorder %s1448_s1, %s1441_s18 }
  0x5c   : > { %p1445_p5 = pneg %p1444_p1  ;;  %p1451_p6 = por %p1450_p13, %p1449_p4 }
  0x5e   : > { %p1452_p10 = pnand %p1451_p6, %p1445_p5 }
  0x60   : > { %1455 = shalt.err (!%p1452_p10)
}
  0x61   : > { %s2113_s23 = smov 4   ;;  %s2114_s29 = smov 64  }
  0x62   : > { %1268 = dma.hbm_to_vmem [thread:$0]  (!%p1714_p11), %s1721_s22, 896, %s1723_s13, %s1725_s15, %s2114_s29, %s2114_s29, %s2113_s23  }
  0x63   : > { %281 = sbr.rel (%p1618_p8) target bundleno = 814 (0x32e), region = 48  ;;  %s1759_s14 = sand.u32 (!%p1618_p8), 1, %s1518_s25  }
  0x64   : > { %s1244_s21 = smul.u32 (!%p1618_p8), 56, %s1759_s14  ;;  %s284_s11 = scalar_lea.sflag (!%p1618_p8), [#allocation3], %s1759_s14 }
  0x65   : > { %p2115_p4 = scmp.ne.s32.totalorder (!%p1618_p8), %s2105_s30, 0 }
  0x66   : > { %s1763_s18 = scalar_lea.vmem (!%p1618_p8), [#allocation2], %s1244_s21 }
  0x6a   : > { %1501 = dma.done.wait (%p2115_p4), %s284_s11, 896  }
  0x6b   : > { %1503 = vsyncadd (%p2115_p4), %s284_s11, 4294966400  ;;  %p2116_p5 = scmp.eq.s32.totalorder %s1599_s28, 0 }
  0x6d   : > { %1505 = dma.done.wait (%p2116_p5), [#allocation6], 2048   ;;  %p2117_p8 = pmov %p2116_p5 }
  0x6e   : > { %v1533_v0 = vmov 0.0   ;;  %vm1534_vm0 = vmmov 0   ;;  %v1319_v1 = vld [vmem:[#allocation5] sm:$0xff]   ;;  %v1320_v2 = vld [vmem:[#allocation5 + $0x8] sm:$0xff]   ;;  %v1321_v3 = vld [vmem:[#allocation5 + $0x10] sm:$0xff]   ;;  %s1245_s19 = smul.u32 112, %s1759_s14 }
  0x6f   : > { %1507 = vsyncadd (%p2117_p8), [#allocation6], 4294965248  ;;  %1155 = vmatprep.subr.bf16.mxu0 %v1533_v0  ;;  %1171 = vmatprep.mubr.msk.bf16.mxu0 %vm1534_vm0, %v1533_v0  ;;  %v1322_v4 = vld [vmem:[#allocation5 + $0x18] sm:$0xff]   ;;  %v1323_v5 = vld [vmem:[#allocation5 + $0x20] sm:$0xff]   ;;  %s1124_s29 = smul.u32 1792, %s1599_s28  ;;  %s979_s28 = scalar_lea.sflag [#allocation4], %s1759_s14 }
  0x70   : > { %1199 = vmatprep.subr.bf16.mxu1 %v1533_v0  ;;  %1215 = vmatprep.mubr.msk.bf16.mxu1 %vm1534_vm0, %v1533_v0  ;;  %v1324_v6 = vld [vmem:[#allocation5 + $0x28] sm:$0xff]   ;;  %v1325_v7 = vld [vmem:[#allocation5 + $0x30] sm:$0xff]   ;;  %v1326_v8 = vld [vmem:[#allocation5 + $0x38] sm:$0xff]   ;;  %s2024_s23 = scalar_lea.vmem [#allocation8], %s1245_s19  ;;  %p2118_p0 = scmp.ne.s32.totalorder %s2111_s16, 0 }
  0x71   : > { %1156 = vmatpush3.bf16.msra.mxu0 %v1319_v1  ;;  %v1327_v9 = vld [vmem:[%s1763_s18] sm:$0xff]   ;;  %v1328_v10 = vld [vmem:[%s1763_s18 + $0x8] sm:$0xff]   ;;  %v1329_v11 = vld [vmem:[%s1763_s18 + $0x10] sm:$0xff]   ;;  %s992_s21 = sshll.u32 %s2024_s23, 4  ;;  %s2043_s30 = scalar_lea.hbm %s2098_s7, %s1124_s29  ;;  %s2045_s21 = int_to_ptr.vmem [resolvable:$true] %s992_s21 }
  0x72   : > { %1157 = vmatprep.subr.bf16.mxu0 %v1533_v0  ;;  %v1330_v12 = vld [vmem:[%s1763_s18 + $0x18] sm:$0xff]   ;;  %v1331_v13 = vld [vmem:[%s1763_s18 + $0x20] sm:$0xff]   ;;  %v1332_v14 = vld [vmem:[%s1763_s18 + $0x28] sm:$0xff]   ;;  %s1456_s9 = scalar_lea.vmem %s2045_s21, 1792  ;;  %s1535_s20 = smov [#allocation8]  }
  0x73   : > { %v1333_v15 = vld [vmem:[%s1763_s18 + $0x30] sm:$0xff]   ;;  %v1808_v16 = vld [vmem:[%s2093_s2] ss:$0 sm:$0xff]  ;;  %v1335_v42 = vld [vmem:[#allocation7 + $0x8] sm:$0xff]   ;;  %p1457_p11 = scmp.ne.s32.totalorder %s2045_s21, %s1456_s9  ;;  %s1460_s22 = sshll.u32 %s1535_s20, 4  ;;  %s1461_s22 = int_to_ptr.vmem [resolvable:$false] %s1460_s22 }
  0x74   : > { %v1334_v39 = vld [vmem:[#allocation7] sm:$0xff]   ;;  %v1336_v49 = vld [vmem:[#allocation7 + $0x10] sm:$0xff]   ;;  %v1337_v53 = vld [vmem:[#allocation7 + $0x18] sm:$0xff]   ;;  %s1462_s13 = scalar_lea.vmem %s1461_s22, 3584  ;;  %p1463_p7 = scmp.lt.s32.totalorder %s2045_s21, %s1461_s22 }
  0x75   : > { %1158 = vmatpush3.bf16.msra.mxu0 %v1320_v2  ;;  %1200 = vmatpush3.bf16.msra.mxu1 %v1334_v39  ;;  %v1338_v59 = vld [vmem:[#allocation7 + $0x20] sm:$0xff]   ;;  %v1339_v63 = vld [vmem:[#allocation7 + $0x28] sm:$0xff]   ;;  %p1458_p2 = pnand %p1457_p11, %p2118_p0  ;;  %p1464_p9 = scmp.lt.s32.totalorder %s1462_s13, %s1456_s9 }
  0x76   : > { %1159 = vmatprep.subr.bf16.mxu0 %v1533_v0  ;;  %1201 = vmatprep.subr.bf16.mxu1 %v1533_v0 }
  0x77   : > { %p1459_p3 = pneg %p1458_p2  ;;  %p1465_p12 = por %p1464_p9, %p1463_p7 }
  0x79   : > { %1160 = vmatpush3.bf16.msra.mxu0 %v1321_v3  ;;  %1202 = vmatpush3.bf16.msra.mxu1 %v1335_v42  ;;  %p1466_p1 = pnand %p1465_p12, %p1459_p3 }
  0x7a   : > { %1161 = vmatprep.subr.bf16.mxu0 %v1533_v0  ;;  %1203 = vmatprep.subr.bf16.mxu1 %v1533_v0 }
  0x7d   : > { %1162 = vmatpush3.bf16.msra.mxu0 %v1322_v4  ;;  %1204 = vmatpush3.bf16.msra.mxu1 %v1336_v49 }
  0x7e   : > { %1163 = vmatprep.subr.bf16.mxu0 %v1533_v0  ;;  %1205 = vmatprep.subr.bf16.mxu1 %v1533_v0 }
  0x81   : > { %1164 = vmatpush3.bf16.msra.mxu0 %v1323_v5  ;;  %1206 = vmatpush3.bf16.msra.mxu1 %v1337_v53 }
  0x82   : > { %1165 = vmatprep.subr.bf16.mxu0 %v1533_v0  ;;  %1207 = vmatprep.subr.bf16.mxu1 %v1533_v0 }
  0x85   : > { %1166 = vmatpush3.bf16.msra.mxu0 %v1324_v6  ;;  %1208 = vmatpush3.bf16.msra.mxu1 %v1338_v59  ;;  %v1340_v6 = vld [vmem:[#allocation7 + $0x30] sm:$0xff]  }
  0x86   : > { %1167 = vmatprep.subr.bf16.mxu0 %v1533_v0  ;;  %1209 = vmatprep.subr.bf16.mxu1 %v1533_v0 }
  0x89   : > { %1168 = vmatpush3.bf16.msra.mxu0 %v1325_v7  ;;  %1210 = vmatpush3.bf16.msra.mxu1 %v1339_v63 }
  0x8a   : > { %1169 = vmatprep.subr.bf16.mxu0 %v1533_v0  ;;  %1211 = vmatprep.subr.bf16.mxu1 %v1533_v0 }
  0x8d   : > { %1170 = vmatpush3.bf16.msra.mxu0 %v1326_v8  ;;  %1212 = vmatpush3.bf16.msra.mxu1 %v1340_v6 }
  0x8e   : > { %1213 = vmatprep.subr.bf16.mxu1 %v1533_v0 }
  0x90   : > { %1172 = vmatmul.mubr.bf16.vlgmr.msra.gmra.mrb[0].mxu0 %v1327_v9 }
  0x91   : > { %1175 = vmatprep.mubr.msk.bf16.mxu0 %vm1534_vm0, %v1533_v0 }
  0x98   : > { %1176 = vmatmul.mubr.bf16.gmra.mrb[4].mxu0 %v1328_v10  ;;  %v1341_v10 = vld [vmem:[#allocation7 + $0x38] sm:$0xff]  }
  0x99   : > { %1179 = vmatprep.mubr.msk.bf16.mxu0 %vm1534_vm0, %v1533_v0  ;;  %1214 = vmatpush3.bf16.msra.mxu1 %v1341_v10 }
  0xa0   : > { %1180 = vmatmul.mubr.bf16.gmra.mrb[8].mxu0 %v1329_v11 }
  0xa1   : > { %1183 = vmatprep.mubr.msk.bf16.mxu0 %vm1534_vm0, %v1533_v0 }
  0xa8   : > { %1184 = vmatmul.mubr.bf16.gmra.mrb[12].mxu0 %v1330_v12 }
  0xa9   : > { %1187 = vmatprep.mubr.msk.bf16.mxu0 %vm1534_vm0, %v1533_v0 }
  0xb0   : > { %1188 = vmatmul.mubr.bf16.gmra.mrb[16].mxu0 %v1331_v13 }
  0xb1   : > { %1191 = vmatprep.mubr.msk.bf16.mxu0 %vm1534_vm0, %v1533_v0 }
  0xb8   : > { %1192 = vmatmul.mubr.bf16.gmra.mrb[20].mxu0 %v1332_v14 }
  0xb9   : > { %1195 = vmatprep.mubr.msk.bf16.mxu0 %vm1534_vm0, %v1533_v0 }
  0xc0   : > { %1196 = vmatmul.mubr.bf16.gmra.mrb[24].mxu0 %v1333_v15 }
 0x163   : > { %v490_v17 = vpop.f32.mrb[0].mxu0 }
 0x164   : > { %v1811_v18 = vadd.f32 %v1808_v16, %v490_v17  ;;  %v1173_v19 = vpop.f32.mrb[1].mxu0 }
 0x165   : > { %v493_v20 = vpop.f32.mrb[2].mxu0 }
 0x166   : > { %v1814_v21 = vadd.f32 %v1808_v16, %v493_v20  ;;  %545 = vadd.xlane.f32.xlu0 %v1811_v18  ;;  %v1174_v22 = vpop.f32.mrb[3].mxu0  ;;  %v573_v23 = vmul.f32 %v1811_v18, %v1811_v18 }
 0x168   : > { %587 = vadd.xlane.f32.xlu1 %v573_v23  ;;  %v574_v24 = vmul.f32 %v1814_v21, %v1814_v21 }
 0x16a   : > { %547 = vadd.xlane.f32.xlu0 %v1814_v21 }
 0x16b   : > { %v498_v25 = vpop.f32.mrb[4].mxu0 }
 0x16c   : > { %v1823_v26 = vadd.f32 %v1808_v16, %v498_v25  ;;  %589 = vadd.xlane.f32.xlu1 %v574_v24  ;;  %v1177_v27 = vpop.f32.mrb[5].mxu0 }
 0x16d   : > { %v501_v28 = vpop.f32.mrb[6].mxu0 }
 0x16e   : > { %v1826_v29 = vadd.f32 %v1808_v16, %v501_v28  ;;  %549 = vadd.xlane.f32.xlu0 %v1823_v26  ;;  %v1178_v30 = vpop.f32.mrb[7].mxu0  ;;  %v575_v31 = vmul.f32 %v1823_v26, %v1823_v26 }
 0x170   : > { %551 = vadd.xlane.f32.xlu1 %v1826_v29  ;;  %v576_v32 = vmul.f32 %v1826_v29, %v1826_v29 }
 0x172   : > { %591 = vadd.xlane.f32.xlu0 %v575_v31 }
 0x173   : > { %v506_v33 = vpop.f32.mrb[8].mxu0 }
 0x174   : > { %v1835_v34 = vadd.f32 %v1808_v16, %v506_v33  ;;  %593 = vadd.xlane.f32.xlu1 %v576_v32  ;;  %v1181_v35 = vpop.f32.mrb[9].mxu0 }
 0x175   : > { %v509_v36 = vpop.f32.mrb[10].mxu0 }
 0x176   : > { %v1838_v37 = vadd.f32 %v1808_v16, %v509_v36  ;;  %553 = vadd.xlane.f32.xlu0 %v1835_v34  ;;  %v1182_v38 = vpop.f32.mrb[11].mxu0  ;;  %v577_v40 = vmul.f32 %v1835_v34, %v1835_v34 }
 0x178   : > { %555 = vadd.xlane.f32.xlu1 %v1838_v37  ;;  %v578_v41 = vmul.f32 %v1838_v37, %v1838_v37 }
 0x17a   : > { %595 = vadd.xlane.f32.xlu0 %v577_v40 }
 0x17b   : > { %v514_v43 = vpop.f32.mrb[12].mxu0 }
 0x17c   : > { %v1848_v44 = vadd.f32 %v1808_v16, %v514_v43  ;;  %597 = vadd.xlane.f32.xlu1 %v578_v41  ;;  %v1185_v45 = vpop.f32.mrb[13].mxu0 }
 0x17d   : > { %v517_v46 = vpop.f32.mrb[14].mxu0 }
 0x17e   : > { %v1852_v47 = vadd.f32 %v1808_v16, %v517_v46  ;;  %557 = vadd.xlane.f32.xlu0 %v1848_v44  ;;  %v1186_v48 = vpop.f32.mrb[15].mxu0  ;;  %v579_v50 = vmul.f32 %v1848_v44, %v1848_v44 }
 0x180   : > { %559 = vadd.xlane.f32.xlu1 %v1852_v47  ;;  %v580_v51 = vmul.f32 %v1852_v47, %v1852_v47 }
 0x182   : > { %599 = vadd.xlane.f32.xlu0 %v579_v50 }
 0x183   : > { %v522_v52 = vpop.f32.mrb[16].mxu0 }
 0x184   : > { %v1862_v54 = vadd.f32 %v1808_v16, %v522_v52  ;;  %601 = vadd.xlane.f32.xlu1 %v580_v51  ;;  %v1189_v55 = vpop.f32.mrb[17].mxu0 }
 0x185   : > { %v525_v56 = vpop.f32.mrb[18].mxu0 }
 0x186   : > { %v1865_v57 = vadd.f32 %v1808_v16, %v525_v56  ;;  %561 = vadd.xlane.f32.xlu0 %v1862_v54  ;;  %v1190_v58 = vpop.f32.mrb[19].mxu0  ;;  %v581_v60 = vmul.f32 %v1862_v54, %v1862_v54 }
 0x188   : > { %563 = vadd.xlane.f32.xlu1 %v1865_v57  ;;  %v582_v61 = vmul.f32 %v1865_v57, %v1865_v57 }
 0x18a   : > { %603 = vadd.xlane.f32.xlu0 %v581_v60 }
 0x18b   : > { %v530_v62 = vpop.f32.mrb[20].mxu0 }
 0x18c   : > { %v1876_v1 = vadd.f32 %v1808_v16, %v530_v62  ;;  %605 = vadd.xlane.f32.xlu1 %v582_v61  ;;  %v1193_v2 = vpop.f32.mrb[21].mxu0 }
 0x18d   : > { %v533_v3 = vpop.f32.mrb[22].mxu0 }
 0x18e   : > { %v1879_v4 = vadd.f32 %v1808_v16, %v533_v3  ;;  %565 = vadd.xlane.f32.xlu0 %v1876_v1  ;;  %v1194_v5 = vpop.f32.mrb[23].mxu0  ;;  %v583_v7 = vmul.f32 %v1876_v1, %v1876_v1 }
 0x190   : > { %567 = vadd.xlane.f32.xlu1 %v1879_v4  ;;  %v584_v8 = vmul.f32 %v1879_v4, %v1879_v4 }
 0x192   : > { %607 = vadd.xlane.f32.xlu0 %v583_v7 }
 0x193   : > { %v538_v9 = vpop.f32.mrb[24].mxu0 }
 0x194   : > { %v1890_v11 = vadd.f32 %v1808_v16, %v538_v9  ;;  %609 = vadd.xlane.f32.xlu1 %v584_v8  ;;  %v1197_v12 = vpop.f32.mrb[25].mxu0  ;;  %v1919_v8 = vld [vmem:[%s2094_s3] ss:$0 sm:$0xff] }
 0x195   : > { %v541_v13 = vpop.f32.mrb[26].mxu0 }
 0x196   : > { %v1893_v14 = vadd.f32 %v1808_v16, %v541_v13  ;;  %569 = vadd.xlane.f32.xlu0 %v1890_v11  ;;  %v1198_v15 = vpop.f32.mrb[27].mxu0  ;;  %v585_v17 = vmul.f32 %v1890_v11, %v1890_v11 }
 0x198   : > { %571 = vadd.xlane.f32.xlu1 %v1893_v14  ;;  %v586_v19 = vmul.f32 %v1893_v14, %v1893_v14 }
 0x19a   : > { %611 = vadd.xlane.f32.xlu0 %v585_v17 }
 0x19c   : > { %613 = vadd.xlane.f32.xlu1 %v586_v19 }
 0x1f3   : > { %v546_v20 = vpop.xlane.xlu0 %545 }
 0x1f4   : > { %v615_v22 = vmul.f32 0.03125, %v546_v20 }
 0x1f5   : > { %v588_v23 = vpop.xlane.xlu1 %587 }
 0x1f6   : > { %v643_v24 = vmul.f32 %v615_v22, %v615_v22  ;;  %v629_v25 = vmul.f32 0.03125, %v588_v23  ;;  %v685_v62 = vsub.f32 %v1811_v18, %v615_v22 }
 0x1f7   : > { %v548_v16 = vpop.xlane.xlu0 %547 }
 0x1f8   : > { %v657_v27 = vsub.f32 %v629_v25, %v643_v24  ;;  %v616_v28 = vmul.f32 0.03125, %v548_v16  ;;  %v1930_v25 = vld [vmem:[%s2095_s4] ss:$0 sm:$0xff] }
 0x1f9   : > { %v590_v30 = vpop.xlane.xlu1 %589 }
 0x1fa   : > { %v671_v31 = vmax.f32 %v657_v27, 0.0  ;;  %v644_v32 = vmul.f32 %v616_v28, %v616_v28  ;;  %v630_v33 = vmul.f32 0.03125, %v590_v30  ;;  %v686_v15 = vsub.f32 %v1814_v21, %v616_v28 }
 0x1fb   : > { %v550_v35 = vpop.xlane.xlu0 %549 }
 0x1fc   : > { %v699_v36 = vadd.f32 1e-05, %v671_v31  ;;  %v658_v38 = vsub.f32 %v630_v33, %v644_v32  ;;  %v1901_v39 = vmul.f32 0.03125, %v550_v35 }
 0x1fd   : > { %v552_v40 = vpop.xlane.xlu1 %551 }
 0x1fe   : > { %1342 = vrsqrt.f32 %v699_v36  ;;  %v672_v41 = vmax.f32 %v658_v38, 0.0  ;;  %v1903_v42 = vmul.f32 0.03125, %v552_v40  ;;  %v645_v46 = vmul.f32 %v1901_v39, %v1901_v39 }
 0x1ff   : > { %v592_v43 = vpop.xlane.xlu0 %591  ;;  %v687_v40 = vsub.f32 %v1823_v26, %v1901_v39 }
 0x200   : > { %v700_v45 = vadd.f32 1e-05, %v672_v41  ;;  %v631_v48 = vmul.f32 0.03125, %v592_v43  ;;  %v646_v50 = vmul.f32 %v1903_v42, %v1903_v42 }
 0x201   : > { %v594_v49 = vpop.xlane.xlu1 %593 }
 0x202   : > { %1344 = vrsqrt.f32 %v700_v45  ;;  %v659_v51 = vsub.f32 %v631_v48, %v645_v46  ;;  %v632_v52 = vmul.f32 0.03125, %v594_v49 }
 0x203   : > { %v554_v53 = vpop.xlane.xlu0 %553 }
 0x204   : > { %v673_v55 = vmax.f32 %v659_v51, 0.0  ;;  %v660_v56 = vsub.f32 %v632_v52, %v646_v50  ;;  %v1909_v58 = vmul.f32 0.03125, %v554_v53  ;;  %v688_v50 = vsub.f32 %v1826_v29, %v1903_v42 }
 0x205   : > { %v556_v59 = vpop.xlane.xlu1 %555 }
 0x206   : > { %v701_v60 = vadd.f32 1e-05, %v673_v55  ;;  %v674_v61 = vmax.f32 %v660_v56, 0.0  ;;  %v1912_v63 = vmul.f32 0.03125, %v556_v59  ;;  %v647_v6 = vmul.f32 %v1909_v58, %v1909_v58 }
 0x207   : > { %v596_v2 = vpop.xlane.xlu0 %595 }
 0x208   : > { %v1343_v3 = vpop.eup %1342  ;;  %1346 = vrsqrt.f32 %v701_v60  ;;  %v702_v5 = vadd.f32 1e-05, %v674_v61  ;;  %v633_v7 = vmul.f32 0.03125, %v596_v2  ;;  %v648_v18 = vmul.f32 %v1912_v63, %v1912_v63 }
 0x209   : > { %v598_v9 = vpop.xlane.xlu1 %597  ;;  %v727_v10 = vmul.f32 %v1343_v3, %v685_v62 }
 0x20a   : > { %1348 = vrsqrt.f32 %v702_v5  ;;  %v661_v12 = vsub.f32 %v633_v7, %v647_v6  ;;  %v634_v13 = vmul.f32 0.03125, %v598_v9 }
 0x20b   : > { %v558_v17 = vpop.xlane.xlu0 %557  ;;  %v748_v19 = vmul.f32 %v1919_v8, %v727_v10 }
 0x20c   : > { %v1345_v20 = vpop.eup %1344  ;;  %v675_v22 = vmax.f32 %v661_v12, 0.0  ;;  %v662_v23 = vsub.f32 %v634_v13, %v648_v18  ;;  %v1925_v24 = vmul.f32 0.03125, %v558_v17  ;;  %v689_v12 = vsub.f32 %v1835_v34, %v1909_v58 }
 0x20d   : > { %v560_v16 = vpop.xlane.xlu1 %559  ;;  %v728_v27 = vmul.f32 %v1345_v20, %v686_v15  ;;  %v769_v33 = vadd.f32 %v1930_v25, %v748_v19 }
 0x20e   : > { %v703_v30 = vadd.f32 1e-05, %v675_v22  ;;  %v676_v31 = vmax.f32 %v662_v23, 0.0  ;;  %v1932_v32 = vmul.f32 0.03125, %v560_v16  ;;  %v649_v36 = vmul.f32 %v1925_v24, %v1925_v24 }
 0x20f   : > { %v600_v21 = vpop.xlane.xlu0 %599  ;;  %v749_v28 = vmul.f32 %v1919_v8, %v728_v27  ;;  %v783_v52 = vmax.f32 %v769_v33, 0.0  ;;  %v690_v23 = vsub.f32 %v1838_v37, %v1912_v63 }
 0x210   : > { %1350 = vrsqrt.f32 %v703_v30  ;;  %v704_v35 = vadd.f32 1e-05, %v676_v31  ;;  %v635_v38 = vmul.f32 0.03125, %v600_v21  ;;  %v650_v46 = vmul.f32 %v1932_v32, %v1932_v32 }
 0x211   : > { %v602_v41 = vpop.xlane.xlu1 %601  ;;  %v770_v43 = vadd.f32 %v1930_v25, %v749_v28 }
 0x212   : > { %v1347_v45 = vpop.eup %1346  ;;  %1352 = vrsqrt.f32 %v704_v35  ;;  %v663_v48 = vsub.f32 %v635_v38, %v649_v36  ;;  %v636_v49 = vmul.f32 0.03125, %v602_v41 }
 0x213   : > { %v562_v51 = vpop.xlane.xlu0 %561  ;;  %v784_v53 = vmax.f32 %v770_v43, 0.0  ;;  %v729_v55 = vmul.f32 %v1347_v45, %v687_v40 }
 0x214   : > { %v1349_v56 = vpop.eup %1348  ;;  %v677_v59 = vmax.f32 %v663_v48, 0.0  ;;  %v664_v26 = vsub.f32 %v636_v49, %v650_v46  ;;  %v1945_v39 = vmul.f32 0.03125, %v562_v51 }
 0x215   : > { %v564_v60 = vpop.xlane.xlu1 %563  ;;  %v797_v61 = vpack.c.bf16 %v784_v53, %v783_v52  ;;  %v730_v62 = vmul.f32 %v1349_v56, %v688_v50  ;;  %v750_v2 = vmul.f32 %v1919_v8, %v729_v55  ;;  %v691_v50 = vsub.f32 %v1848_v44, %v1925_v24 }
 0x216   : > { %v705_v3 = vadd.f32 1e-05, %v677_v59  ;;  %v678_v5 = vmax.f32 %v664_v26, 0.0  ;;  %v1948_v6 = vmul.f32 0.03125, %v564_v60  ;;  %v651_v10 = vmul.f32 %v1945_v39, %v1945_v39 }
 0x217   : > { %1216 = vmatmul.mubr.bf16.vlgmr.msra.gmra.mrb[0].mxu1 %v797_v61  ;;  %v604_v29 = vpop.xlane.xlu0 %603  ;;  %v751_v42 = vmul.f32 %v1919_v8, %v730_v62  ;;  %v771_v7 = vadd.f32 %v1930_v25, %v750_v2  ;;  %v692_v26 = vsub.f32 %v1852_v47, %v1932_v32 }
 0x218   : > { %1354 = vrsqrt.f32 %v705_v3  ;;  %v706_v9 = vadd.f32 1e-05, %v678_v5  ;;  %v637_v18 = vmul.f32 0.03125, %v604_v29  ;;  %1219 = vmatprep.mubr.msk.bf16.mxu1 %vm1534_vm0, %v1533_v0  ;;  %v652_v19 = vmul.f32 %v1948_v6, %v1948_v6 }
 0x219   : > { %v606_v13 = vpop.xlane.xlu1 %605  ;;  %v772_v15 = vadd.f32 %v1930_v25, %v751_v42  ;;  %v785_v27 = vmax.f32 %v771_v7, 0.0 }
 0x21a   : > { %v1351_v17 = vpop.eup %1350  ;;  %1356 = vrsqrt.f32 %v706_v9  ;;  %v665_v20 = vsub.f32 %v637_v18, %v651_v10  ;;  %v638_v22 = vmul.f32 0.03125, %v606_v13 }
 0x21b   : > { %v566_v16 = vpop.xlane.xlu0 %565  ;;  %v786_v30 = vmax.f32 %v772_v15, 0.0  ;;  %v731_v31 = vmul.f32 %v1351_v17, %v689_v12 }
 0x21c   : > { %v1353_v21 = vpop.eup %1352  ;;  %v679_v28 = vmax.f32 %v665_v20, 0.0  ;;  %v666_v34 = vsub.f32 %v638_v22, %v652_v19  ;;  %v1963_v58 = vmul.f32 0.03125, %v566_v16  ;;  %v693_v20 = vsub.f32 %v1862_v54, %v1945_v39 }
 0x21d   : > { %v568_v33 = vpop.xlane.xlu1 %567  ;;  %v798_v35 = vpack.c.bf16 %v786_v30, %v785_v27  ;;  %v732_v36 = vmul.f32 %v1353_v21, %v690_v23  ;;  %v752_v38 = vmul.f32 %v1919_v8, %v731_v31  ;;  %v694_v21 = vsub.f32 %v1865_v57, %v1948_v6 }
 0x21e   : > { %v707_v40 = vadd.f32 1e-05, %v679_v28  ;;  %v680_v41 = vmax.f32 %v666_v34, 0.0  ;;  %v1966_v43 = vmul.f32 0.03125, %v568_v33  ;;  %v653_v48 = vmul.f32 %v1963_v58, %v1963_v58 }
 0x21f   : > { %1220 = vmatmul.mubr.bf16.gmra.mrb[4].mxu1 %v798_v35  ;;  %v608_v37 = vpop.xlane.xlu0 %607  ;;  %v753_v63 = vmul.f32 %v1919_v8, %v732_v36  ;;  %v773_v45 = vadd.f32 %v1930_v25, %v752_v38  ;;  %v695_v57 = vsub.f32 %v1876_v1, %v1963_v58 }
 0x220   : > { %1358 = vrsqrt.f32 %v707_v40  ;;  %v708_v46 = vadd.f32 1e-05, %v680_v41  ;;  %v639_v49 = vmul.f32 0.03125, %v608_v37  ;;  %1223 = vmatprep.mubr.msk.bf16.mxu1 %vm1534_vm0, %v1533_v0  ;;  %v654_v55 = vmul.f32 %v1966_v43, %v1966_v43 }
 0x221   : > { %v610_v51 = vpop.xlane.xlu1 %609  ;;  %v774_v52 = vadd.f32 %v1930_v25, %v753_v63  ;;  %v787_v61 = vmax.f32 %v773_v45, 0.0 }
 0x222   : > { %v1355_v53 = vpop.eup %1354  ;;  %1360 = vrsqrt.f32 %v708_v46  ;;  %v667_v56 = vsub.f32 %v639_v49, %v653_v48  ;;  %v640_v59 = vmul.f32 0.03125, %v610_v51  ;;  %v696_v49 = vsub.f32 %v1879_v4, %v1966_v43 }
 0x223   : > { %v570_v60 = vpop.xlane.xlu0 %569  ;;  %v788_v62 = vmax.f32 %v774_v52, 0.0  ;;  %v733_v2 = vmul.f32 %v1355_v53, %v691_v50 }
 0x224   : > { %v1357_v3 = vpop.eup %1356  ;;  %v681_v5 = vmax.f32 %v667_v56, 0.0  ;;  %v668_v44 = vsub.f32 %v640_v59, %v654_v55  ;;  %v1981_v24 = vmul.f32 0.03125, %v570_v60 }
 0x225   : > { %v572_v29 = vpop.xlane.xlu1 %571  ;;  %v799_v42 = vpack.c.bf16 %v788_v62, %v787_v61  ;;  %v734_v7 = vmul.f32 %v1357_v3, %v692_v26  ;;  %v754_v9 = vmul.f32 %v1919_v8, %v733_v2 }
 0x226   : > { %v709_v10 = vadd.f32 1e-05, %v681_v5  ;;  %v682_v18 = vmax.f32 %v668_v44, 0.0  ;;  %v628_v12 = vmul.f32 0.03125, %v572_v29  ;;  %v655_v17 = vmul.f32 %v1981_v24, %v1981_v24 }
 0x227   : > { %1224 = vmatmul.mubr.bf16.gmra.mrb[8].mxu1 %v799_v42  ;;  %v612_v13 = vpop.xlane.xlu0 %611  ;;  %v755_v47 = vmul.f32 %v1919_v8, %v734_v7  ;;  %v775_v32 = vadd.f32 %v1930_v25, %v754_v9  ;;  %v697_v58 = vsub.f32 %v1890_v11, %v1981_v24 }
 0x228   : > { %1362 = vrsqrt.f32 %v709_v10  ;;  %v710_v15 = vadd.f32 1e-05, %v682_v18  ;;  %v641_v19 = vmul.f32 0.03125, %v612_v13  ;;  %1227 = vmatprep.mubr.msk.bf16.mxu1 %vm1534_vm0, %v1533_v0  ;;  %v656_v27 = vmul.f32 %v628_v12, %v628_v12  ;;  %v1111_v10 = vld [vmem:[%s2097_s6] ss:$0 sm:$0xff] }
 0x229   : > { %v614_v22 = vpop.xlane.xlu1 %613  ;;  %v776_v23 = vadd.f32 %v1930_v25, %v755_v47  ;;  %v789_v28 = vmax.f32 %v775_v32, 0.0  ;;  %v698_v60 = vsub.f32 %v1893_v14, %v628_v12 }
 0x22a   : > { %v1359_v16 = vpop.eup %1358  ;;  %1364 = vrsqrt.f32 %v710_v15  ;;  %v669_v30 = vsub.f32 %v641_v19, %v655_v17  ;;  %v642_v31 = vmul.f32 0.03125, %v614_v22 }
 0x22b   : > { %v790_v34 = vmax.f32 %v776_v23, 0.0  ;;  %v735_v33 = vmul.f32 %v1359_v16, %v693_v20 }
 0x22c   : > { %v1361_v35 = vpop.eup %1360  ;;  %v683_v36 = vmax.f32 %v669_v30, 0.0  ;;  %v670_v38 = vsub.f32 %v642_v31, %v656_v27 }
 0x22d   : > { %v800_v40 = vpack.c.bf16 %v790_v34, %v789_v28  ;;  %v736_v41 = vmul.f32 %v1361_v35, %v694_v21  ;;  %v756_v54 = vmul.f32 %v1919_v8, %v735_v33 }
 0x22e   : > { %v711_v39 = vadd.f32 1e-05, %v683_v36  ;;  %v684_v37 = vmax.f32 %v670_v38, 0.0 }
 0x22f   : > { %1228 = vmatmul.mubr.bf16.gmra.mrb[12].mxu1 %v800_v40  ;;  %v757_v63 = vmul.f32 %v1919_v8, %v736_v41  ;;  %v777_v45 = vadd.f32 %v1930_v25, %v756_v54 }
 0x230   : > { %1366 = vrsqrt.f32 %v711_v39  ;;  %v712_v46 = vadd.f32 1e-05, %v684_v37  ;;  %1231 = vmatprep.mubr.msk.bf16.mxu1 %vm1534_vm0, %v1533_v0 }
 0x231   : > { %v778_v6 = vadd.f32 %v1930_v25, %v757_v63  ;;  %v791_v50 = vmax.f32 %v777_v45, 0.0 }
 0x232   : > { %v1363_v48 = vpop.eup %1362  ;;  %1368 = vrsqrt.f32 %v712_v46 }
 0x233   : > { %v792_v51 = vmax.f32 %v778_v6, 0.0  ;;  %v737_v52 = vmul.f32 %v1363_v48, %v695_v57 }
 0x234   : > { %v1365_v53 = vpop.eup %1364 }
 0x235   : > { %v801_v55 = vpack.c.bf16 %v792_v51, %v791_v50  ;;  %v738_v56 = vmul.f32 %v1365_v53, %v696_v49  ;;  %v758_v59 = vmul.f32 %v1919_v8, %v737_v52 }
 0x237   : > { %1232 = vmatmul.mubr.bf16.gmra.mrb[16].mxu1 %v801_v55  ;;  %v759_v26 = vmul.f32 %v1919_v8, %v738_v56  ;;  %v779_v1 = vadd.f32 %v1930_v25, %v758_v59 }
 0x238   : > { %1235 = vmatprep.mubr.msk.bf16.mxu1 %vm1534_vm0, %v1533_v0 }
 0x239   : > { %v780_v4 = vadd.f32 %v1930_v25, %v759_v26  ;;  %v793_v61 = vmax.f32 %v779_v1, 0.0 }
 0x23a   : > { %v1367_v43 = vpop.eup %1366 }
 0x23b   : > { %v794_v62 = vmax.f32 %v780_v4, 0.0  ;;  %v739_v2 = vmul.f32 %v1367_v43, %v697_v58 }
 0x23c   : > { %v1369_v3 = vpop.eup %1368 }
 0x23d   : > { %v802_v5 = vpack.c.bf16 %v794_v62, %v793_v61  ;;  %v740_v44 = vmul.f32 %v1369_v3, %v698_v60  ;;  %v760_v29 = vmul.f32 %v1919_v8, %v739_v2 }
 0x23f   : > { %1236 = vmatmul.mubr.bf16.gmra.mrb[20].mxu1 %v802_v5  ;;  %v761_v42 = vmul.f32 %v1919_v8, %v740_v44  ;;  %v781_v7 = vadd.f32 %v1930_v25, %v760_v29 }
 0x240   : > { %1239 = vmatprep.mubr.msk.bf16.mxu1 %vm1534_vm0, %v1533_v0 }
 0x241   : > { %v782_v11 = vadd.f32 %v1930_v25, %v761_v42  ;;  %v795_v14 = vmax.f32 %v781_v7, 0.0 }
 0x243   : > { %v796_v24 = vmax.f32 %v782_v11, 0.0 }
 0x245   : > { %v803_v9 = vpack.c.bf16 %v796_v24, %v795_v14 }
 0x247   : > { %1240 = vmatmul.mubr.bf16.gmra.mrb[24].mxu1 %v803_v9 }
 0x2ea   : > { %v909_v18 = vpop.f32.mrb[0].mxu1 }
 0x2eb   : > { %v910_v12 = vadd.f32 %v1111_v10, %v909_v18  ;;  %v1217_v13 = vpop.f32.mrb[1].mxu1 }
 0x2ec   : > { %v912_v8 = vpop.f32.mrb[2].mxu1 }
 0x2ed   : > { %964 = vst [vmem:[%s2024_s23] sm:$0xff] %v910_v12  ;;  %v913_v0 = vadd.f32 %v1111_v10, %v912_v8  ;;  %v1218_v25 = vpop.f32.mrb[3].mxu1 }
 0x2ef   : > { %965 = vst [vmem:[%s2024_s23 + $0x8] sm:$0xff] %v913_v0 }
 0x2f2   : > { %v917_v47 = vpop.f32.mrb[4].mxu1 }
 0x2f3   : > { %v918_v32 = vadd.f32 %v1111_v10, %v917_v47  ;;  %v1221_v15 = vpop.f32.mrb[5].mxu1 }
 0x2f4   : > { %v920_v17 = vpop.f32.mrb[6].mxu1 }
 0x2f5   : > { %966 = vst [vmem:[%s2024_s23 + $0x10] sm:$0xff] %v918_v32  ;;  %v921_v19 = vadd.f32 %v1111_v10, %v920_v17  ;;  %v1222_v20 = vpop.f32.mrb[7].mxu1 }
 0x2f7   : > { %967 = vst [vmem:[%s2024_s23 + $0x18] sm:$0xff] %v921_v19 }
 0x2fa   : > { %v925_v22 = vpop.f32.mrb[8].mxu1 }
 0x2fb   : > { %v926_v23 = vadd.f32 %v1111_v10, %v925_v22  ;;  %v1225_v16 = vpop.f32.mrb[9].mxu1 }
 0x2fc   : > { %v928_v27 = vpop.f32.mrb[10].mxu1 }
 0x2fd   : > { %968 = vst [vmem:[%s2024_s23 + $0x20] sm:$0xff] %v926_v23  ;;  %v929_v30 = vadd.f32 %v1111_v10, %v928_v27  ;;  %v1226_v31 = vpop.f32.mrb[11].mxu1 }
 0x2ff   : > { %969 = vst [vmem:[%s2024_s23 + $0x28] sm:$0xff] %v929_v30 }
 0x302   : > { %v933_v21 = vpop.f32.mrb[12].mxu1 }
 0x303   : > { %v934_v28 = vadd.f32 %v1111_v10, %v933_v21  ;;  %v1229_v34 = vpop.f32.mrb[13].mxu1 }
 0x304   : > { %v936_v33 = vpop.f32.mrb[14].mxu1 }
 0x305   : > { %970 = vst [vmem:[%s2024_s23 + $0x30] sm:$0xff] %v934_v28  ;;  %v937_v35 = vadd.f32 %v1111_v10, %v936_v33  ;;  %v1230_v36 = vpop.f32.mrb[15].mxu1 }
 0x307   : > { %971 = vst [vmem:[%s2024_s23 + $0x38] sm:$0xff] %v937_v35 }
 0x30a   : > { %v941_v38 = vpop.f32.mrb[16].mxu1 }
 0x30b   : > { %v942_v40 = vadd.f32 %v1111_v10, %v941_v38  ;;  %v1233_v41 = vpop.f32.mrb[17].mxu1 }
 0x30c   : > { %v944_v54 = vpop.f32.mrb[18].mxu1 }
 0x30d   : > { %972 = vst [vmem:[%s2024_s23 + $0x40] sm:$0xff] %v942_v40  ;;  %v945_v39 = vadd.f32 %v1111_v10, %v944_v54  ;;  %v1234_v37 = vpop.f32.mrb[19].mxu1 }
 0x30f   : > { %973 = vst [vmem:[%s2024_s23 + $0x48] sm:$0xff] %v945_v39 }
 0x312   : > { %v949_v63 = vpop.f32.mrb[20].mxu1 }
 0x313   : > { %v950_v45 = vadd.f32 %v1111_v10, %v949_v63  ;;  %v1237_v46 = vpop.f32.mrb[21].mxu1 }
 0x314   : > { %v952_v57 = vpop.f32.mrb[22].mxu1 }
 0x315   : > { %974 = vst [vmem:[%s2024_s23 + $0x50] sm:$0xff] %v950_v45  ;;  %v953_v6 = vadd.f32 %v1111_v10, %v952_v57  ;;  %v1238_v48 = vpop.f32.mrb[23].mxu1 }
 0x317   : > { %975 = vst [vmem:[%s2024_s23 + $0x58] sm:$0xff] %v953_v6 }
 0x31a   : > { %v957_v49 = vpop.f32.mrb[24].mxu1 }
 0x31b   : > { %v958_v50 = vadd.f32 %v1111_v10, %v957_v49  ;;  %v1241_v51 = vpop.f32.mrb[25].mxu1 }
 0x31c   : > { %v960_v52 = vpop.f32.mrb[26].mxu1 }
 0x31d   : > { %976 = vst [vmem:[%s2024_s23 + $0x60] sm:$0xff] %v958_v50  ;;  %v961_v53 = vadd.f32 %v1111_v10, %v960_v52  ;;  %v1242_v55 = vpop.f32.mrb[27].mxu1 }
 0x31f   : > { %977 = vst [vmem:[%s2024_s23 + $0x68] sm:$0xff] %v961_v53 }
 0x320   : > { %1469 = shalt.err (!%p1466_p1)
}
 0x321   : > { %s1470_s15 = scalar_lea.hbm %s2043_s30, 1792  ;;  %s1474_s1 = scalar_lea.hbm %s2098_s7, 3584 }
 0x322   : > { %p1471_p13 = scmp.ne.s32.totalorder %s2043_s30, %s1470_s15  ;;  %p1475_p4 = scmp.lt.u32.totalorder %s2043_s30, %s2098_s7 }
 0x323   : > { %p1476_p5 = scmp.lt.u32.totalorder %s1474_s1, %s1470_s15  ;;  %p1478_p11 = scmp.lt.u32.totalorder %s1470_s15, %s2043_s30 }
 0x324   : > { %p1472_p6 = pnand %p1471_p13, %p2118_p0 }
 0x325   : > { %p1477_p8 = por %p1476_p5, %p1475_p4 }
 0x326   : > { %p1473_p10 = pneg %p1472_p6 }
 0x327   : > { %p1479_p2 = por %p1478_p11, %p1477_p8 }
 0x329   : > { %p1480_p3 = pnand %p1479_p2, %p1473_p10 }
 0x32b   : > { %1483 = shalt.err (!%p1480_p3)
}
 0x32c   : > { %s1536_s11 = smov 128   ;;  %s1537_s18 = smov 8  }
 0x32d   : > { %1256 = dma.vmem_to_hbm [thread:$0]  (%p2118_p0), %s2045_s21, 1792, %s2043_s30, %s979_s28, %s1536_s11, %s1536_s11, %s1537_s18  }
 0x32e PF: > { %s1007_s9 = sand.u32 1, %s1514_s24   ;;  %p2119_p7 = scmp.ne.s32.totalorder %s2106_s8, 0 }
 0x32f   : > { %p2120_p9 = scmp.ge.s32.totalorder %s1526_s27, 2  ;;  %s1008_s20 = scalar_lea.sflag [#allocation4], %s1007_s9 }
 0x331   : > { %p1270_p12 = pnand %p2120_p9, %p2119_p7 }
 0x333   : > { %1509 = dma.done.wait (!%p1270_p12), %s1008_s20, 1792  }
 0x334   : > { %1511 = vsyncadd (!%p1270_p12), %s1008_s20, 4294965504  ;;  %p21_p1 = scmp.ge.s32.totalorder %s1694_s12, 4   ;;  %s2121_s24 = smov %s1518_s25 }
 0x335   : > { %s2122_s25 = smov %s1522_s26  ;;  %s2123_s26 = smov %s1710_s17 }
 0x336   : > { %s2124_s27 = smov %s1694_s12  ;;  %23 = sbr.rel (!%p21_p1) target bundleno = 8 (0x8), region = 101 }
 0x33d   :  { %1013 = vsyncpa [#allocation3], 1 }
 0x33e   :  { %1015 = vsyncpa [#allocation3 + $0x1], 1 }
 0x33f   :  { %1016 = vsyncpa [#allocation6], 1 }
 0x340   :  { %1017 = vsyncpa [#allocation4], 1 }
 0x341   :  { %1019 = vsyncpa [#allocation4 + $0x1], 1 }

</bundles_post_ra>
